<compile_context>
chip_gen: v7x
topology: tpu7x:2x2x1
jax: 0.10.0
libtpu: 0.0.40
codegen_flags: <defaults>
</compile_context>

<pallas_src>
import functools

import jax
import jax.numpy as jnp
from jax.experimental import pallas as pl
from jax.experimental.pallas import tpu as pltpu


def _round_up(x, m):
    return ((x + m - 1) // m) * m


def _vmem_capacity_bytes():
    try:
        return int(pltpu.get_tpu_info().vmem_capacity_bytes)
    except Exception:
        return 64 * 1024 * 1024  # conservative fallback (v7x per-TensorCore VMEM)


def _estimate_step_vmem(tro, ho, wo_c, cin, c_pad, stride, nphase, weight_bufs):
    """Per-grid-step VMEM footprint (bytes), counting every resident buffer."""
    ho_pad = _round_up(ho, tro)
    hreq = ho_pad + 2 // stride
    wreq = wo_c + 2 // stride
    in_bytes = 2 * nphase * hreq * wreq * cin * 2     # bf16 phase images, double-buffered
    w_bytes = weight_bufs * 9 * cin * c_pad * 2       # bf16 weight taps
    out_bytes = 2 * tro * wo_c * c_pad * 4            # f32 output tile, double-buffered
    acc_bytes = 2 * tro * wo_c * c_pad * 4            # in-kernel f32 accumulator + temps
    misc = 4 * c_pad * 4 * 4 + (1 << 20)              # scale/shift/stats blocks + slack
    return in_bytes + w_bytes + out_bytes + acc_bytes + misc


def _pick_row_tile(ho, wo_c, cin, c_pad, stride, nphase, weight_bufs, budget):
    """Largest output-row tile (multiple of 8) whose per-step footprint fits the budget.

    Bigger tiles amortize the ~0.35us/grid-step overhead and keep the M side of the MXU
    full (the M-tile tro*wo_c is a multiple of 256 whenever wo_c >= 32)."""
    cand = _round_up(ho, 8)
    cands = []
    while cand >= 8:
        cands.append(cand)
        if cand == 8:
            break
        cand = max(8, (cand // 2 // 8) * 8)
    for tro in cands:
        if _estimate_step_vmem(tro, ho, wo_c, cin, c_pad, stride,
                               nphase, weight_bufs) <= budget:
            return tro
    raise ValueError(
        "DiscBlock Pallas kernel: a per-batch-element padded image does not fit in the "
        "VMEM budget; row-tiled halo streaming is not implemented (see module TODO).")


def _accumulate_conv(x_refs, w_ref, t, *, stride, tro, wo_c, cin, c_pad):
    """3x3/pad-1/stride-s conv for output rows [t*tro, (t+1)*tro) as 9 shifted matmuls.

    Each tap (kh, kw) reads a contiguous (tro, wo_c, cin) window of one stride-phase
    image and contributes a bf16 (tro*wo_c, cin) x (cin, c_pad) MXU matmul accumulated
    in f32."""
    m = tro * wo_c
    base = pl.multiple_of(t * tro, tro)
    acc = jnp.zeros((m, c_pad), jnp.float32)
    for kh in range(3):
        for kw in range(3):
            p = (kh % stride) * stride + (kw % stride)
            a = x_refs[p][0,
                          pl.ds(base + kh // stride, tro),
                          pl.ds(kw // stride, wo_c),
                          :]                              # (tro, wo_c, cin) bf16
            # wo_c is a multiple of 8, so this reshape is a pure sublane regroup.
            acc = acc + jnp.dot(a.reshape(m, cin), w_ref[kh * 3 + kw],
                                preferred_element_type=jnp.float32)
    return acc


# ---------------- pass 1: per-step partial sum / sum-of-squares of the conv ----------------
def _stats_kernel(*refs, stride, tro, wo_c, cin, c_pad, nphase):
    x_refs = refs[:nphase]
    w_ref = refs[nphase]
    stats_ref = refs[nphase + 1]                          # (1, 1, 2, c_pad)
    acc = _accumulate_conv(x_refs, w_ref, pl.program_id(1), stride=stride, tro=tro,
                           wo_c=wo_c, cin=cin, c_pad=c_pad)
    stats_ref[0, 0, 0:1, :] = jnp.sum(acc, axis=0, keepdims=True)
    stats_ref[0, 0, 1:2, :] = jnp.sum(acc * acc, axis=0, keepdims=True)


# ---------------- pass 2: recompute conv, fused BN FMA + LeakyReLU ----------------
def _bn_lrelu_kernel(*refs, stride, tro, wo_c, cin, c_pad, nphase, neg_slope):
    x_refs = refs[:nphase]
    w_ref = refs[nphase]
    scale_ref = refs[nphase + 1]                          # (1, c_pad)
    shift_ref = refs[nphase + 2]                          # (1, c_pad)
    o_ref = refs[nphase + 3]                              # (1, tro*wo_c, c_pad)
    acc = _accumulate_conv(x_refs, w_ref, pl.program_id(1), stride=stride, tro=tro,
                           wo_c=wo_c, cin=cin, c_pad=c_pad)
    y = acc * scale_ref[...] + shift_ref[...]
    o_ref[0] = jnp.where(y >= 0, y, neg_slope * y).astype(o_ref.dtype)


def _disc_block_impl(x_nchw, w_oihw, gamma, beta, stride, eps, neg_slope,
                     single_buffer_weight):
    N, Cin, H, W = x_nchw.shape
    Cout = w_oihw.shape[0]
    s = int(stride)
    Ho = (H + 2 - 3) // s + 1
    Wo = (W + 2 - 3) // s + 1
    # Lane-dense channel padding (unmasked stores, full MXU N).  TODO(synk): for very
    # small Cout a masked true-Cout store writes 16x fewer bytes -- worth benchmarking.
    C_pad = _round_up(Cout, 128)
    Wo_c = _round_up(Wo, 8)        # compute width: keeps in-kernel reshapes layout-trivial
    nphase = s * s

    vmem_cap = _vmem_capacity_bytes()
    weight_bufs = 1 if single_buffer_weight else 2
    tro = _pick_row_tile(Ho, Wo_c, Cin, C_pad, s, nphase, weight_bufs,
                         budget=int(vmem_cap * 0.70))
    vmem_limit = int(vmem_cap * 0.85)   # headroom for Pallas-internal scratch/semaphores
    Ho_pad = _round_up(Ho, tro)
    n_t = Ho_pad // tro
    Hreq = Ho_pad + 2 // s
    Wreq = Wo_c + 2 // s

    # ---- host layout glue: one pass over the input, no 9x im2col slab ----
    # NCHW -> NHWC, zero-pad (conv pad=1 plus bottom/right slack for padded output
    # rows/cols), split into s*s stride-phase views so every 3x3 tap is a contiguous
    # (row, col) offset inside the kernel.
    x = jnp.transpose(x_nchw, (0, 2, 3, 1)).astype(jnp.float32)
    Hbig = max(s * Hreq, H + 2)
    Wbig = max(s * Wreq, W + 2)
    xpad = jnp.pad(x, ((0, 0), (1, Hbig - H - 1), (1, Wbig - W - 1), (0, 0)))
    phases = [xpad[:, r::s, c::s, :][:, :Hreq, :Wreq, :].astype(jnp.bfloat16)
              for r in range(s) for c in range(s)]

    # (Cout, Cin, 3, 3) -> 9 taps of (Cin, C_pad), bf16 for the MXU.
    w_taps = jnp.transpose(w_oihw.astype(jnp.float32), (2, 3, 1, 0)).reshape(9, Cin, Cout)
    w_taps = jnp.pad(w_taps, ((0, 0), (0, 0), (0, C_pad - Cout))).astype(jnp.bfloat16)

    phase_specs = [pl.BlockSpec((1, Hreq, Wreq, Cin), lambda n, t: (n, 0, 0, 0))
                   for _ in range(nphase)]
    if single_buffer_weight:
        # The weight block never changes -> one VMEM copy is enough.
        w_spec = pl.BlockSpec((9, Cin, C_pad), lambda n, t: (0, 0, 0),
                              pipeline_mode=pl.Buffered(1))
    else:
        w_spec = pl.BlockSpec((9, Cin, C_pad), lambda n, t: (0, 0, 0))

    common = dict(stride=s, tro=tro, wo_c=Wo_c, cin=Cin, c_pad=C_pad, nphase=nphase)
    cparams = pltpu.CompilerParams(
        dimension_semantics=("parallel", "parallel"),   # megacore-shardable on v7x
        vmem_limit_bytes=vmem_limit,
    )

    # ---- pass 1: BN statistics (partial sums per grid step, reduced outside) ----
    stats = pl.pallas_call(
        functools.partial(_stats_kernel, **common),
        out_shape=jax.ShapeDtypeStruct((N, n_t, 2, C_pad), jnp.float32),
        grid_spec=pltpu.PrefetchScalarGridSpec(
            num_scalar_prefetch=0,
            grid=(N, n_t),
            in_specs=phase_specs + [w_spec],
            out_specs=pl.BlockSpec((1, 1, 2, C_pad), lambda n, t: (n, t, 0, 0)),
        ),
        compiler_params=cparams,
    )(*phases, w_taps)

    # Padded rows / cols / channels contribute exactly zero (zero inputs, no bias), so
    # dividing by the true element count gives exact training-mode statistics.
    # NOTE: single-pass E[x^2]-E[x]^2 in f32 -- adequate at these magnitudes; switch to
    # per-tile mean-centered partials for very large M or strongly offset activations.
    inv_m = jnp.float32(1.0 / (N * Ho * Wo))
    csum = jnp.sum(stats[:, :, 0, :], axis=(0, 1))
    csumsq = jnp.sum(stats[:, :, 1, :], axis=(0, 1))
    mean = csum * inv_m
    var = jnp.maximum(csumsq * inv_m - mean * mean, 0.0)
    gamma_p = jnp.pad(gamma.astype(jnp.float32), (0, C_pad - Cout))
    beta_p = jnp.pad(beta.astype(jnp.float32), (0, C_pad - Cout))
    scale = (gamma_p * jax.lax.rsqrt(var + eps)).reshape(1, C_pad)
    shift = (beta_p - mean * scale[0]).reshape(1, C_pad)

    # ---- pass 2: recompute conv (cheap for small K) + folded BN FMA + LeakyReLU ----
    out_flat = pl.pallas_call(
        functools.partial(_bn_lrelu_kernel, neg_slope=neg_slope, **common),
        out_shape=jax.ShapeDtypeStruct((N, Ho_pad * Wo_c, C_pad), jnp.float32),
        grid_spec=pltpu.PrefetchScalarGridSpec(
            num_scalar_prefetch=0,
            grid=(N, n_t),
            in_specs=phase_specs + [
                w_spec,
                pl.BlockSpec((1, C_pad), lambda n, t: (0, 0)),
                pl.BlockSpec((1, C_pad), lambda n, t: (0, 0)),
            ],
            out_specs=pl.BlockSpec((1, tro * Wo_c, C_pad), lambda n, t: (n, t, 0)),
        ),
        compiler_params=cparams,
    )(*phases, w_taps, scale, shift)

    # Slice off padding, return NCHW for module parity.  When chaining DiscBlocks, keep
    # the NHWC / (rows, C_pad) slab instead and skip this layout pass.
    out = out_flat.reshape(N, Ho_pad, Wo_c, C_pad)[:, :Ho, :Wo, :Cout]
    return jnp.transpose(out, (0, 3, 1, 2))


def disc_block_forward(x_nchw, w_oihw, b, gamma, beta, *, stride, eps=1e-5,
                       neg_slope=0.2):
    """Forward pass of DiscBlock.  x_nchw: (N, Cin, H, W) -> (N, Cout, Ho, Wo).

    `b` (Conv2d bias) is accepted for signature parity but unused: a per-channel shift
    before training-mode BatchNorm cancels exactly (reinstate it if this path is ever
    reused with eval-mode running statistics)."""
    del b
    try:
        return _disc_block_impl(x_nchw, w_oihw, gamma, beta, stride, eps, neg_slope,
                                single_buffer_weight=True)
    except Exception:
        # Fallback if pl.Buffered(1) single-buffering of the resident weight taps is
        # not supported by the installed JAX/Pallas version.
        return _disc_block_impl(x_nchw, w_oihw, gamma, beta, stride, eps, neg_slope,
                                single_buffer_weight=False)


def _reference_forward(x_nchw, w_oihw, b, gamma, beta, *, stride, eps=1e-5,
                       neg_slope=0.2):
    """Pure-JAX reference matching PyTorch semantics (training-mode BatchNorm)."""
    y = jax.lax.conv_general_dilated(
        x_nchw.astype(jnp.float32), w_oihw.astype(jnp.float32),
        window_strides=(stride, stride), padding=((1, 1), (1, 1)),
        dimension_numbers=("NCHW", "OIHW", "NCHW"),
    ) + b.reshape(1, -1, 1, 1)
    mean = jnp.mean(y, axis=(0, 2, 3), keepdims=True)
    var = jnp.mean(jnp.square(y - mean), axis=(0, 2, 3), keepdims=True)
    yn = (y - mean) * jax.lax.rsqrt(var + eps)
    yn = yn * gamma.reshape(1, -1, 1, 1) + beta.reshape(1, -1, 1, 1)
    return jnp.where(yn >= 0, yn, neg_slope * yn)


if __name__ == "__main__":
    # DiscBlock(in_channel=4, out_channel=8, stride=2) on a (2, 4, 16, 16) input.
    N, Cin, H, W = 2, 4, 16, 16
    Cout, stride = 8, 2

    key = jax.random.PRNGKey(0)
    kx, kw, kb = jax.random.split(key, 3)
    x = jax.random.normal(kx, (N, Cin, H, W), dtype=jnp.float32)
    w = jax.random.normal(kw, (Cout, Cin, 3, 3), dtype=jnp.float32) * 0.1  # Conv2d.weight
    b = jax.random.normal(kb, (Cout,), dtype=jnp.float32) * 0.1            # Conv2d.bias
    gamma = jnp.ones((Cout,), dtype=jnp.float32)                           # BatchNorm2d.weight
    beta = jnp.zeros((Cout,), dtype=jnp.float32)                           # BatchNorm2d.bias

    out = disc_block_forward(x, w, b, gamma, beta, stride=stride)
    out = jax.block_until_ready(out)

    ref = _reference_forward(x, w, b, gamma, beta, stride=stride)
    assert out.shape == (N, Cout, H // stride, W // stride), out.shape
    err = float(jnp.max(jnp.abs(out - ref)))
    # bf16 MXU inputs (f32 accumulation): tolerance relaxed from the old f32-GEMM 1e-4.
    assert jnp.allclose(out, ref, atol=3e-2, rtol=3e-2), err

    print("KERNEL_OK")
</pallas_src>

<mosaic_0001>
module attributes {stable_mosaic.version = 11 : i64} {
  func.func @_stats_kernel(%arg0: i32, %arg1: i32, %arg2: memref<1x9x9x4xbf16, #tpu.memory_space<vmem>>, %arg3: memref<1x9x9x4xbf16, #tpu.memory_space<vmem>>, %arg4: memref<1x9x9x4xbf16, #tpu.memory_space<vmem>>, %arg5: memref<1x9x9x4xbf16, #tpu.memory_space<vmem>>, %arg6: memref<9x4x128xbf16, #tpu.memory_space<vmem>>, %arg7: memref<1x1x2x128xf32, #tpu.memory_space<vmem>>) attributes {dimension_semantics = [#tpu.dimension_semantics<parallel>, #tpu.dimension_semantics<parallel>], iteration_bounds = array<i64: 2, 1>, scalar_prefetch = 0 : i64, scratch_operands = 0 : i64, tpu.core_type = #tpu.core_type<tc>, window_params = [{transform_indices = @transform_0, window_bounds = array<i64: 1, 9, 9, 4>}, {transform_indices = @transform_1, window_bounds = array<i64: 1, 9, 9, 4>}, {transform_indices = @transform_2, window_bounds = array<i64: 1, 9, 9, 4>}, {transform_indices = @transform_3, window_bounds = array<i64: 1, 9, 9, 4>}, {pipeline_mode = #tpu.pipeline_mode<synchronous>, transform_indices = @transform_4, window_bounds = array<i64: 9, 4, 128>}, {transform_indices = @transform_5, window_bounds = array<i64: 1, 1, 2, 128>}]} {
    %c8_i32 = arith.constant 8 : i32
    %0 = arith.muli %arg1, %c8_i32 : i32
    %1 = tpu.assume_multiple %0, 8 : i32
    %cst = arith.constant 0.000000e+00 : f32
    %2 = vector.broadcast %cst : f32 to vector<64x128xf32>
    %c0_i32 = arith.constant 0 : i32
    %3 = arith.addi %1, %c0_i32 : i32
    %c0 = arith.constant 0 : index
    %4 = arith.index_cast %3 : i32 to index
    %c0_0 = arith.constant 0 : index
    %c0_1 = arith.constant 0 : index
    %5 = vector.load %arg2[%c0, %4, %c0_0, %c0_1] : memref<1x9x9x4xbf16, #tpu.memory_space<vmem>>, vector<1x8x8x4xbf16>
    %6 = vector.shape_cast %5 : vector<1x8x8x4xbf16> to vector<8x8x4xbf16>
    %7 = vector.shape_cast %6 : vector<8x8x4xbf16> to vector<64x4xbf16>
    %c0_2 = arith.constant 0 : index
    %c0_3 = arith.constant 0 : index
    %c0_4 = arith.constant 0 : index
    %8 = vector.load %arg6[%c0_2, %c0_3, %c0_4] : memref<9x4x128xbf16, #tpu.memory_space<vmem>>, vector<1x4x128xbf16>
    %9 = vector.shape_cast %8 : vector<1x4x128xbf16> to vector<4x128xbf16>
    %cst_5 = arith.constant dense<0.000000e+00> : vector<64x128xf32>
    %10 = tpu.matmul %7, %9, %cst_5 {dimension_numbers = #tpu.dot_dimension_numbers<[1], [0], [0], [1], [0, 0, 1, 1], [], []>} : vector<64x4xbf16>, vector<4x128xbf16>, vector<64x128xf32> -> vector<64x128xf32>
    %11 = arith.addf %2, %10 : vector<64x128xf32>
    %c0_i32_6 = arith.constant 0 : i32
    %12 = arith.addi %1, %c0_i32_6 : i32
    %c0_7 = arith.constant 0 : index
    %13 = arith.index_cast %12 : i32 to index
    %c0_8 = arith.constant 0 : index
    %c0_9 = arith.constant 0 : index
    %14 = vector.load %arg3[%c0_7, %13, %c0_8, %c0_9] : memref<1x9x9x4xbf16, #tpu.memory_space<vmem>>, vector<1x8x8x4xbf16>
    %15 = vector.shape_cast %14 : vector<1x8x8x4xbf16> to vector<8x8x4xbf16>
    %16 = vector.shape_cast %15 : vector<8x8x4xbf16> to vector<64x4xbf16>
    %c1 = arith.constant 1 : index
    %c0_10 = arith.constant 0 : index
    %c0_11 = arith.constant 0 : index
    %17 = vector.load %arg6[%c1, %c0_10, %c0_11] : memref<9x4x128xbf16, #tpu.memory_space<vmem>>, vector<1x4x128xbf16>
    %18 = vector.shape_cast %17 : vector<1x4x128xbf16> to vector<4x128xbf16>
    %cst_12 = arith.constant dense<0.000000e+00> : vector<64x128xf32>
    %19 = tpu.matmul %16, %18, %cst_12 {dimension_numbers = #tpu.dot_dimension_numbers<[1], [0], [0], [1], [0, 0, 1, 1], [], []>} : vector<64x4xbf16>, vector<4x128xbf16>, vector<64x128xf32> -> vector<64x128xf32>
    %20 = arith.addf %11, %19 : vector<64x128xf32>
    %c0_i32_13 = arith.constant 0 : i32
    %21 = arith.addi %1, %c0_i32_13 : i32
    %c0_14 = arith.constant 0 : index
    %22 = arith.index_cast %21 : i32 to index
    %c1_15 = arith.constant 1 : index
    %c0_16 = arith.constant 0 : index
    %23 = vector.load %arg2[%c0_14, %22, %c1_15, %c0_16] : memref<1x9x9x4xbf16, #tpu.memory_space<vmem>>, vector<1x8x8x4xbf16>
    %24 = vector.shape_cast %23 : vector<1x8x8x4xbf16> to vector<8x8x4xbf16>
    %25 = vector.shape_cast %24 : vector<8x8x4xbf16> to vector<64x4xbf16>
    %c2 = arith.constant 2 : index
    %c0_17 = arith.constant 0 : index
    %c0_18 = arith.constant 0 : index
    %26 = vector.load %arg6[%c2, %c0_17, %c0_18] : memref<9x4x128xbf16, #tpu.memory_space<vmem>>, vector<1x4x128xbf16>
    %27 = vector.shape_cast %26 : vector<1x4x128xbf16> to vector<4x128xbf16>
    %cst_19 = arith.constant dense<0.000000e+00> : vector<64x128xf32>
    %28 = tpu.matmul %25, %27, %cst_19 {dimension_numbers = #tpu.dot_dimension_numbers<[1], [0], [0], [1], [0, 0, 1, 1], [], []>} : vector<64x4xbf16>, vector<4x128xbf16>, vector<64x128xf32> -> vector<64x128xf32>
    %29 = arith.addf %20, %28 : vector<64x128xf32>
    %c0_i32_20 = arith.constant 0 : i32
    %30 = arith.addi %1, %c0_i32_20 : i32
    %c0_21 = arith.constant 0 : index
    %31 = arith.index_cast %30 : i32 to index
    %c0_22 = arith.constant 0 : index
    %c0_23 = arith.constant 0 : index
    %32 = vector.load %arg4[%c0_21, %31, %c0_22, %c0_23] : memref<1x9x9x4xbf16, #tpu.memory_space<vmem>>, vector<1x8x8x4xbf16>
    %33 = vector.shape_cast %32 : vector<1x8x8x4xbf16> to vector<8x8x4xbf16>
    %34 = vector.shape_cast %33 : vector<8x8x4xbf16> to vector<64x4xbf16>
    %c3 = arith.constant 3 : index
    %c0_24 = arith.constant 0 : index
    %c0_25 = arith.constant 0 : index
    %35 = vector.load %arg6[%c3, %c0_24, %c0_25] : memref<9x4x128xbf16, #tpu.memory_space<vmem>>, vector<1x4x128xbf16>
    %36 = vector.shape_cast %35 : vector<1x4x128xbf16> to vector<4x128xbf16>
    %cst_26 = arith.constant dense<0.000000e+00> : vector<64x128xf32>
    %37 = tpu.matmul %34, %36, %cst_26 {dimension_numbers = #tpu.dot_dimension_numbers<[1], [0], [0], [1], [0, 0, 1, 1], [], []>} : vector<64x4xbf16>, vector<4x128xbf16>, vector<64x128xf32> -> vector<64x128xf32>
    %38 = arith.addf %29, %37 : vector<64x128xf32>
    %c0_i32_27 = arith.constant 0 : i32
    %39 = arith.addi %1, %c0_i32_27 : i32
    %c0_28 = arith.constant 0 : index
    %40 = arith.index_cast %39 : i32 to index
    %c0_29 = arith.constant 0 : index
    %c0_30 = arith.constant 0 : index
    %41 = vector.load %arg5[%c0_28, %40, %c0_29, %c0_30] : memref<1x9x9x4xbf16, #tpu.memory_space<vmem>>, vector<1x8x8x4xbf16>
    %42 = vector.shape_cast %41 : vector<1x8x8x4xbf16> to vector<8x8x4xbf16>
    %43 = vector.shape_cast %42 : vector<8x8x4xbf16> to vector<64x4xbf16>
    %c4 = arith.constant 4 : index
    %c0_31 = arith.constant 0 : index
    %c0_32 = arith.constant 0 : index
    %44 = vector.load %arg6[%c4, %c0_31, %c0_32] : memref<9x4x128xbf16, #tpu.memory_space<vmem>>, vector<1x4x128xbf16>
    %45 = vector.shape_cast %44 : vector<1x4x128xbf16> to vector<4x128xbf16>
    %cst_33 = arith.constant dense<0.000000e+00> : vector<64x128xf32>
    %46 = tpu.matmul %43, %45, %cst_33 {dimension_numbers = #tpu.dot_dimension_numbers<[1], [0], [0], [1], [0, 0, 1, 1], [], []>} : vector<64x4xbf16>, vector<4x128xbf16>, vector<64x128xf32> -> vector<64x128xf32>
    %47 = arith.addf %38, %46 : vector<64x128xf32>
    %c0_i32_34 = arith.constant 0 : i32
    %48 = arith.addi %1, %c0_i32_34 : i32
    %c0_35 = arith.constant 0 : index
    %49 = arith.index_cast %48 : i32 to index
    %c1_36 = arith.constant 1 : index
    %c0_37 = arith.constant 0 : index
    %50 = vector.load %arg4[%c0_35, %49, %c1_36, %c0_37] : memref<1x9x9x4xbf16, #tpu.memory_space<vmem>>, vector<1x8x8x4xbf16>
    %51 = vector.shape_cast %50 : vector<1x8x8x4xbf16> to vector<8x8x4xbf16>
    %52 = vector.shape_cast %51 : vector<8x8x4xbf16> to vector<64x4xbf16>
    %c5 = arith.constant 5 : index
    %c0_38 = arith.constant 0 : index
    %c0_39 = arith.constant 0 : index
    %53 = vector.load %arg6[%c5, %c0_38, %c0_39] : memref<9x4x128xbf16, #tpu.memory_space<vmem>>, vector<1x4x128xbf16>
    %54 = vector.shape_cast %53 : vector<1x4x128xbf16> to vector<4x128xbf16>
    %cst_40 = arith.constant dense<0.000000e+00> : vector<64x128xf32>
    %55 = tpu.matmul %52, %54, %cst_40 {dimension_numbers = #tpu.dot_dimension_numbers<[1], [0], [0], [1], [0, 0, 1, 1], [], []>} : vector<64x4xbf16>, vector<4x128xbf16>, vector<64x128xf32> -> vector<64x128xf32>
    %56 = arith.addf %47, %55 : vector<64x128xf32>
    %c1_i32 = arith.constant 1 : i32
    %57 = arith.addi %1, %c1_i32 : i32
    %c0_41 = arith.constant 0 : index
    %58 = arith.index_cast %57 : i32 to index
    %c0_42 = arith.constant 0 : index
    %c0_43 = arith.constant 0 : index
    %59 = vector.load %arg2[%c0_41, %58, %c0_42, %c0_43] : memref<1x9x9x4xbf16, #tpu.memory_space<vmem>>, vector<1x8x8x4xbf16>
    %60 = vector.shape_cast %59 : vector<1x8x8x4xbf16> to vector<8x8x4xbf16>
    %61 = vector.shape_cast %60 : vector<8x8x4xbf16> to vector<64x4xbf16>
    %c6 = arith.constant 6 : index
    %c0_44 = arith.constant 0 : index
    %c0_45 = arith.constant 0 : index
    %62 = vector.load %arg6[%c6, %c0_44, %c0_45] : memref<9x4x128xbf16, #tpu.memory_space<vmem>>, vector<1x4x128xbf16>
    %63 = vector.shape_cast %62 : vector<1x4x128xbf16> to vector<4x128xbf16>
    %cst_46 = arith.constant dense<0.000000e+00> : vector<64x128xf32>
    %64 = tpu.matmul %61, %63, %cst_46 {dimension_numbers = #tpu.dot_dimension_numbers<[1], [0], [0], [1], [0, 0, 1, 1], [], []>} : vector<64x4xbf16>, vector<4x128xbf16>, vector<64x128xf32> -> vector<64x128xf32>
    %65 = arith.addf %56, %64 : vector<64x128xf32>
    %c1_i32_47 = arith.constant 1 : i32
    %66 = arith.addi %1, %c1_i32_47 : i32
    %c0_48 = arith.constant 0 : index
    %67 = arith.index_cast %66 : i32 to index
    %c0_49 = arith.constant 0 : index
    %c0_50 = arith.constant 0 : index
    %68 = vector.load %arg3[%c0_48, %67, %c0_49, %c0_50] : memref<1x9x9x4xbf16, #tpu.memory_space<vmem>>, vector<1x8x8x4xbf16>
    %69 = vector.shape_cast %68 : vector<1x8x8x4xbf16> to vector<8x8x4xbf16>
    %70 = vector.shape_cast %69 : vector<8x8x4xbf16> to vector<64x4xbf16>
    %c7 = arith.constant 7 : index
    %c0_51 = arith.constant 0 : index
    %c0_52 = arith.constant 0 : index
    %71 = vector.load %arg6[%c7, %c0_51, %c0_52] : memref<9x4x128xbf16, #tpu.memory_space<vmem>>, vector<1x4x128xbf16>
    %72 = vector.shape_cast %71 : vector<1x4x128xbf16> to vector<4x128xbf16>
    %cst_53 = arith.constant dense<0.000000e+00> : vector<64x128xf32>
    %73 = tpu.matmul %70, %72, %cst_53 {dimension_numbers = #tpu.dot_dimension_numbers<[1], [0], [0], [1], [0, 0, 1, 1], [], []>} : vector<64x4xbf16>, vector<4x128xbf16>, vector<64x128xf32> -> vector<64x128xf32>
    %74 = arith.addf %65, %73 : vector<64x128xf32>
    %c1_i32_54 = arith.constant 1 : i32
    %75 = arith.addi %1, %c1_i32_54 : i32
    %c0_55 = arith.constant 0 : index
    %76 = arith.index_cast %75 : i32 to index
    %c1_56 = arith.constant 1 : index
    %c0_57 = arith.constant 0 : index
    %77 = vector.load %arg2[%c0_55, %76, %c1_56, %c0_57] : memref<1x9x9x4xbf16, #tpu.memory_space<vmem>>, vector<1x8x8x4xbf16>
    %78 = vector.shape_cast %77 : vector<1x8x8x4xbf16> to vector<8x8x4xbf16>
    %79 = vector.shape_cast %78 : vector<8x8x4xbf16> to vector<64x4xbf16>
    %c8 = arith.constant 8 : index
    %c0_58 = arith.constant 0 : index
    %c0_59 = arith.constant 0 : index
    %80 = vector.load %arg6[%c8, %c0_58, %c0_59] : memref<9x4x128xbf16, #tpu.memory_space<vmem>>, vector<1x4x128xbf16>
    %81 = vector.shape_cast %80 : vector<1x4x128xbf16> to vector<4x128xbf16>
    %cst_60 = arith.constant dense<0.000000e+00> : vector<64x128xf32>
    %82 = tpu.matmul %79, %81, %cst_60 {dimension_numbers = #tpu.dot_dimension_numbers<[1], [0], [0], [1], [0, 0, 1, 1], [], []>} : vector<64x4xbf16>, vector<4x128xbf16>, vector<64x128xf32> -> vector<64x128xf32>
    %83 = arith.addf %74, %82 : vector<64x128xf32>
    %cst_61 = arith.constant dense<0.000000e+00> : vector<128xf32>
    %84 = vector.multi_reduction <add>, %83, %cst_61 [0] : vector<64x128xf32> to vector<128xf32>
    %85 = vector.shape_cast %84 : vector<128xf32> to vector<1x128xf32>
    %c0_62 = arith.constant 0 : index
    %c0_63 = arith.constant 0 : index
    %c0_64 = arith.constant 0 : index
    %c0_65 = arith.constant 0 : index
    %86 = vector.load %arg7[%c0_62, %c0_63, %c0_64, %c0_65] : memref<1x1x2x128xf32, #tpu.memory_space<vmem>>, vector<1x1x1x128xf32>
    %87 = vector.shape_cast %86 : vector<1x1x1x128xf32> to vector<1x128xf32>
    %88 = vector.shape_cast %85 : vector<1x128xf32> to vector<1x1x1x128xf32>
    tpu.vector_store %arg7[%c0_62, %c0_63, %c0_64, %c0_65], %88 {strides = array<i32>} : memref<1x1x2x128xf32, #tpu.memory_space<vmem>>, vector<1x1x1x128xf32>,
    %89 = arith.mulf %83, %83 : vector<64x128xf32>
    %cst_66 = arith.constant dense<0.000000e+00> : vector<128xf32>
    %90 = vector.multi_reduction <add>, %89, %cst_66 [0] : vector<64x128xf32> to vector<128xf32>
    %91 = vector.shape_cast %90 : vector<128xf32> to vector<1x128xf32>
    %c0_67 = arith.constant 0 : index
    %c0_68 = arith.constant 0 : index
    %c1_69 = arith.constant 1 : index
    %c0_70 = arith.constant 0 : index
    %92 = vector.load %arg7[%c0_67, %c0_68, %c1_69, %c0_70] : memref<1x1x2x128xf32, #tpu.memory_space<vmem>>, vector<1x1x1x128xf32>
    %93 = vector.shape_cast %92 : vector<1x1x1x128xf32> to vector<1x128xf32>
    %94 = vector.shape_cast %91 : vector<1x128xf32> to vector<1x1x1x128xf32>
    tpu.vector_store %arg7[%c0_67, %c0_68, %c1_69, %c0_70], %94 {strides = array<i32>} : memref<1x1x2x128xf32, #tpu.memory_space<vmem>>, vector<1x1x1x128xf32>,
    return
  }
  func.func @transform_0(%arg0: i32, %arg1: i32) -> (i32, i32, i32, i32) {
    %c0_i32 = arith.constant 0 : i32
    %c0_i32_0 = arith.constant 0 : i32
    %c0_i32_1 = arith.constant 0 : i32
    %c0_i32_2 = arith.constant 0 : i32
    return %arg0, %c0_i32, %c0_i32_0, %c0_i32_1 : i32, i32, i32, i32
  }
  func.func @transform_1(%arg0: i32, %arg1: i32) -> (i32, i32, i32, i32) {
    %c0_i32 = arith.constant 0 : i32
    %c0_i32_0 = arith.constant 0 : i32
    %c0_i32_1 = arith.constant 0 : i32
    %c0_i32_2 = arith.constant 0 : i32
    return %arg0, %c0_i32, %c0_i32_0, %c0_i32_1 : i32, i32, i32, i32
  }
  func.func @transform_2(%arg0: i32, %arg1: i32) -> (i32, i32, i32, i32) {
    %c0_i32 = arith.constant 0 : i32
    %c0_i32_0 = arith.constant 0 : i32
    %c0_i32_1 = arith.constant 0 : i32
    %c0_i32_2 = arith.constant 0 : i32
    return %arg0, %c0_i32, %c0_i32_0, %c0_i32_1 : i32, i32, i32, i32
  }
  func.func @transform_3(%arg0: i32, %arg1: i32) -> (i32, i32, i32, i32) {
    %c0_i32 = arith.constant 0 : i32
    %c0_i32_0 = arith.constant 0 : i32
    %c0_i32_1 = arith.constant 0 : i32
    %c0_i32_2 = arith.constant 0 : i32
    return %arg0, %c0_i32, %c0_i32_0, %c0_i32_1 : i32, i32, i32, i32
  }
  func.func @transform_4(%arg0: i32, %arg1: i32) -> (i32, i32, i32) {
    %c0_i32 = arith.constant 0 : i32
    %c0_i32_0 = arith.constant 0 : i32
    %c0_i32_1 = arith.constant 0 : i32
    %c0_i32_2 = arith.constant 0 : i32
    return %c0_i32, %c0_i32_0, %c0_i32_1 : i32, i32, i32
  }
  func.func @transform_5(%arg0: i32, %arg1: i32) -> (i32, i32, i32, i32) {
    %c0_i32 = arith.constant 0 : i32
    %c0_i32_0 = arith.constant 0 : i32
    %c0_i32_1 = arith.constant 0 : i32
    return %arg0, %arg1, %c0_i32, %c0_i32_0 : i32, i32, i32, i32
  }
}

module attributes {stable_mosaic.version = 11 : i64} {
  func.func @_stats_kernel(%arg0: i32, %arg1: i32, %arg2: memref<1x9x9x4xbf16, #tpu.memory_space<vmem>>, %arg3: memref<1x9x9x4xbf16, #tpu.memory_space<vmem>>, %arg4: memref<1x9x9x4xbf16, #tpu.memory_space<vmem>>, %arg5: memref<1x9x9x4xbf16, #tpu.memory_space<vmem>>, %arg6: memref<9x4x128xbf16, #tpu.memory_space<vmem>>, %arg7: memref<1x1x2x128xf32, #tpu.memory_space<vmem>>) attributes {dimension_semantics = [#tpu.dimension_semantics<parallel>, #tpu.dimension_semantics<parallel>], iteration_bounds = array<i64: 2, 1>, scalar_prefetch = 0 : i64, scratch_operands = 0 : i64, tpu.core_type = #tpu.core_type<tc>, window_params = [{transform_indices = @transform_0, window_bounds = array<i64: 1, 9, 9, 4>}, {transform_indices = @transform_1, window_bounds = array<i64: 1, 9, 9, 4>}, {transform_indices = @transform_2, window_bounds = array<i64: 1, 9, 9, 4>}, {transform_indices = @transform_3, window_bounds = array<i64: 1, 9, 9, 4>}, {pipeline_mode = #tpu.pipeline_mode<synchronous>, transform_indices = @transform_4, window_bounds = array<i64: 9, 4, 128>}, {transform_indices = @transform_5, window_bounds = array<i64: 1, 1, 2, 128>}]} {
    %c8_i32 = arith.constant 8 : i32
    %0 = arith.muli %arg1, %c8_i32 : i32
    %1 = tpu.assume_multiple %0, 8 : i32
    %cst = arith.constant 0.000000e+00 : f32
    %2 = vector.broadcast %cst : f32 to vector<64x128xf32>
    %c0_i32 = arith.constant 0 : i32
    %3 = arith.addi %1, %c0_i32 : i32
    %c0 = arith.constant 0 : index
    %4 = arith.index_cast %3 : i32 to index
    %c0_0 = arith.constant 0 : index
    %c0_1 = arith.constant 0 : index
    %5 = vector.load %arg2[%c0, %4, %c0_0, %c0_1] : memref<1x9x9x4xbf16, #tpu.memory_space<vmem>>, vector<1x8x8x4xbf16>
    %6 = vector.shape_cast %5 : vector<1x8x8x4xbf16> to vector<8x8x4xbf16>
    %7 = vector.shape_cast %6 : vector<8x8x4xbf16> to vector<64x4xbf16>
    %c0_2 = arith.constant 0 : index
    %c0_3 = arith.constant 0 : index
    %c0_4 = arith.constant 0 : index
    %8 = vector.load %arg6[%c0_2, %c0_3, %c0_4] : memref<9x4x128xbf16, #tpu.memory_space<vmem>>, vector<1x4x128xbf16>
    %9 = vector.shape_cast %8 : vector<1x4x128xbf16> to vector<4x128xbf16>
    %cst_5 = arith.constant dense<0.000000e+00> : vector<64x128xf32>
    %10 = tpu.matmul %7, %9, %cst_5 {dimension_numbers = #tpu.dot_dimension_numbers<[1], [0], [0], [1], [0, 0, 1, 1], [], []>} : vector<64x4xbf16>, vector<4x128xbf16>, vector<64x128xf32> -> vector<64x128xf32>
    %11 = arith.addf %2, %10 : vector<64x128xf32>
    %c0_i32_6 = arith.constant 0 : i32
    %12 = arith.addi %1, %c0_i32_6 : i32
    %c0_7 = arith.constant 0 : index
    %13 = arith.index_cast %12 : i32 to index
    %c0_8 = arith.constant 0 : index
    %c0_9 = arith.constant 0 : index
    %14 = vector.load %arg3[%c0_7, %13, %c0_8, %c0_9] : memref<1x9x9x4xbf16, #tpu.memory_space<vmem>>, vector<1x8x8x4xbf16>
    %15 = vector.shape_cast %14 : vector<1x8x8x4xbf16> to vector<8x8x4xbf16>
    %16 = vector.shape_cast %15 : vector<8x8x4xbf16> to vector<64x4xbf16>
    %c1 = arith.constant 1 : index
    %c0_10 = arith.constant 0 : index
    %c0_11 = arith.constant 0 : index
    %17 = vector.load %arg6[%c1, %c0_10, %c0_11] : memref<9x4x128xbf16, #tpu.memory_space<vmem>>, vector<1x4x128xbf16>
    %18 = vector.shape_cast %17 : vector<1x4x128xbf16> to vector<4x128xbf16>
    %cst_12 = arith.constant dense<0.000000e+00> : vector<64x128xf32>
    %19 = tpu.matmul %16, %18, %cst_12 {dimension_numbers = #tpu.dot_dimension_numbers<[1], [0], [0], [1], [0, 0, 1, 1], [], []>} : vector<64x4xbf16>, vector<4x128xbf16>, vector<64x128xf32> -> vector<64x128xf32>
    %20 = arith.addf %11, %19 : vector<64x128xf32>
    %c0_i32_13 = arith.constant 0 : i32
    %21 = arith.addi %1, %c0_i32_13 : i32
    %c0_14 = arith.constant 0 : index
    %22 = arith.index_cast %21 : i32 to index
    %c1_15 = arith.constant 1 : index
    %c0_16 = arith.constant 0 : index
    %23 = vector.load %arg2[%c0_14, %22, %c1_15, %c0_16] : memref<1x9x9x4xbf16, #tpu.memory_space<vmem>>, vector<1x8x8x4xbf16>
    %24 = vector.shape_cast %23 : vector<1x8x8x4xbf16> to vector<8x8x4xbf16>
    %25 = vector.shape_cast %24 : vector<8x8x4xbf16> to vector<64x4xbf16>
    %c2 = arith.constant 2 : index
    %c0_17 = arith.constant 0 : index
    %c0_18 = arith.constant 0 : index
    %26 = vector.load %arg6[%c2, %c0_17, %c0_18] : memref<9x4x128xbf16, #tpu.memory_space<vmem>>, vector<1x4x128xbf16>
    %27 = vector.shape_cast %26 : vector<1x4x128xbf16> to vector<4x128xbf16>
    %cst_19 = arith.constant dense<0.000000e+00> : vector<64x128xf32>
    %28 = tpu.matmul %25, %27, %cst_19 {dimension_numbers = #tpu.dot_dimension_numbers<[1], [0], [0], [1], [0, 0, 1, 1], [], []>} : vector<64x4xbf16>, vector<4x128xbf16>, vector<64x128xf32> -> vector<64x128xf32>
    %29 = arith.addf %20, %28 : vector<64x128xf32>
    %c0_i32_20 = arith.constant 0 : i32
    %30 = arith.addi %1, %c0_i32_20 : i32
    %c0_21 = arith.constant 0 : index
    %31 = arith.index_cast %30 : i32 to index
    %c0_22 = arith.constant 0 : index
    %c0_23 = arith.constant 0 : index
    %32 = vector.load %arg4[%c0_21, %31, %c0_22, %c0_23] : memref<1x9x9x4xbf16, #tpu.memory_space<vmem>>, vector<1x8x8x4xbf16>
    %33 = vector.shape_cast %32 : vector<1x8x8x4xbf16> to vector<8x8x4xbf16>
    %34 = vector.shape_cast %33 : vector<8x8x4xbf16> to vector<64x4xbf16>
    %c3 = arith.constant 3 : index
    %c0_24 = arith.constant 0 : index
    %c0_25 = arith.constant 0 : index
    %35 = vector.load %arg6[%c3, %c0_24, %c0_25] : memref<9x4x128xbf16, #tpu.memory_space<vmem>>, vector<1x4x128xbf16>
    %36 = vector.shape_cast %35 : vector<1x4x128xbf16> to vector<4x128xbf16>
    %cst_26 = arith.constant dense<0.000000e+00> : vector<64x128xf32>
    %37 = tpu.matmul %34, %36, %cst_26 {dimension_numbers = #tpu.dot_dimension_numbers<[1], [0], [0], [1], [0, 0, 1, 1], [], []>} : vector<64x4xbf16>, vector<4x128xbf16>, vector<64x128xf32> -> vector<64x128xf32>
    %38 = arith.addf %29, %37 : vector<64x128xf32>
    %c0_i32_27 = arith.constant 0 : i32
    %39 = arith.addi %1, %c0_i32_27 : i32
    %c0_28 = arith.constant 0 : index
    %40 = arith.index_cast %39 : i32 to index
    %c0_29 = arith.constant 0 : index
    %c0_30 = arith.constant 0 : index
    %41 = vector.load %arg5[%c0_28, %40, %c0_29, %c0_30] : memref<1x9x9x4xbf16, #tpu.memory_space<vmem>>, vector<1x8x8x4xbf16>
    %42 = vector.shape_cast %41 : vector<1x8x8x4xbf16> to vector<8x8x4xbf16>
    %43 = vector.shape_cast %42 : vector<8x8x4xbf16> to vector<64x4xbf16>
    %c4 = arith.constant 4 : index
    %c0_31 = arith.constant 0 : index
    %c0_32 = arith.constant 0 : index
    %44 = vector.load %arg6[%c4, %c0_31, %c0_32] : memref<9x4x128xbf16, #tpu.memory_space<vmem>>, vector<1x4x128xbf16>
    %45 = vector.shape_cast %44 : vector<1x4x128xbf16> to vector<4x128xbf16>
    %cst_33 = arith.constant dense<0.000000e+00> : vector<64x128xf32>
    %46 = tpu.matmul %43, %45, %cst_33 {dimension_numbers = #tpu.dot_dimension_numbers<[1], [0], [0], [1], [0, 0, 1, 1], [], []>} : vector<64x4xbf16>, vector<4x128xbf16>, vector<64x128xf32> -> vector<64x128xf32>
    %47 = arith.addf %38, %46 : vector<64x128xf32>
    %c0_i32_34 = arith.constant 0 : i32
    %48 = arith.addi %1, %c0_i32_34 : i32
    %c0_35 = arith.constant 0 : index
    %49 = arith.index_cast %48 : i32 to index
    %c1_36 = arith.constant 1 : index
    %c0_37 = arith.constant 0 : index
    %50 = vector.load %arg4[%c0_35, %49, %c1_36, %c0_37] : memref<1x9x9x4xbf16, #tpu.memory_space<vmem>>, vector<1x8x8x4xbf16>
    %51 = vector.shape_cast %50 : vector<1x8x8x4xbf16> to vector<8x8x4xbf16>
    %52 = vector.shape_cast %51 : vector<8x8x4xbf16> to vector<64x4xbf16>
    %c5 = arith.constant 5 : index
    %c0_38 = arith.constant 0 : index
    %c0_39 = arith.constant 0 : index
    %53 = vector.load %arg6[%c5, %c0_38, %c0_39] : memref<9x4x128xbf16, #tpu.memory_space<vmem>>, vector<1x4x128xbf16>
    %54 = vector.shape_cast %53 : vector<1x4x128xbf16> to vector<4x128xbf16>
    %cst_40 = arith.constant dense<0.000000e+00> : vector<64x128xf32>
    %55 = tpu.matmul %52, %54, %cst_40 {dimension_numbers = #tpu.dot_dimension_numbers<[1], [0], [0], [1], [0, 0, 1, 1], [], []>} : vector<64x4xbf16>, vector<4x128xbf16>, vector<64x128xf32> -> vector<64x128xf32>
    %56 = arith.addf %47, %55 : vector<64x128xf32>
    %c1_i32 = arith.constant 1 : i32
    %57 = arith.addi %1, %c1_i32 : i32
    %c0_41 = arith.constant 0 : index
    %58 = arith.index_cast %57 : i32 to index
    %c0_42 = arith.constant 0 : index
    %c0_43 = arith.constant 0 : index
    %59 = vector.load %arg2[%c0_41, %58, %c0_42, %c0_43] : memref<1x9x9x4xbf16, #tpu.memory_space<vmem>>, vector<1x8x8x4xbf16>
    %60 = vector.shape_cast %59 : vector<1x8x8x4xbf16> to vector<8x8x4xbf16>
    %61 = vector.shape_cast %60 : vector<8x8x4xbf16> to vector<64x4xbf16>
    %c6 = arith.constant 6 : index
    %c0_44 = arith.constant 0 : index
    %c0_45 = arith.constant 0 : index
    %62 = vector.load %arg6[%c6, %c0_44, %c0_45] : memref<9x4x128xbf16, #tpu.memory_space<vmem>>, vector<1x4x128xbf16>
    %63 = vector.shape_cast %62 : vector<1x4x128xbf16> to vector<4x128xbf16>
    %cst_46 = arith.constant dense<0.000000e+00> : vector<64x128xf32>
    %64 = tpu.matmul %61, %63, %cst_46 {dimension_numbers = #tpu.dot_dimension_numbers<[1], [0], [0], [1], [0, 0, 1, 1], [], []>} : vector<64x4xbf16>, vector<4x128xbf16>, vector<64x128xf32> -> vector<64x128xf32>
    %65 = arith.addf %56, %64 : vector<64x128xf32>
    %c1_i32_47 = arith.constant 1 : i32
    %66 = arith.addi %1, %c1_i32_47 : i32
    %c0_48 = arith.constant 0 : index
    %67 = arith.index_cast %66 : i32 to index
    %c0_49 = arith.constant 0 : index
    %c0_50 = arith.constant 0 : index
    %68 = vector.load %arg3[%c0_48, %67, %c0_49, %c0_50] : memref<1x9x9x4xbf16, #tpu.memory_space<vmem>>, vector<1x8x8x4xbf16>
    %69 = vector.shape_cast %68 : vector<1x8x8x4xbf16> to vector<8x8x4xbf16>
    %70 = vector.shape_cast %69 : vector<8x8x4xbf16> to vector<64x4xbf16>
    %c7 = arith.constant 7 : index
    %c0_51 = arith.constant 0 : index
    %c0_52 = arith.constant 0 : index
    %71 = vector.load %arg6[%c7, %c0_51, %c0_52] : memref<9x4x128xbf16, #tpu.memory_space<vmem>>, vector<1x4x128xbf16>
    %72 = vector.shape_cast %71 : vector<1x4x128xbf16> to vector<4x128xbf16>
    %cst_53 = arith.constant dense<0.000000e+00> : vector<64x128xf32>
    %73 = tpu.matmul %70, %72, %cst_53 {dimension_numbers = #tpu.dot_dimension_numbers<[1], [0], [0], [1], [0, 0, 1, 1], [], []>} : vector<64x4xbf16>, vector<4x128xbf16>, vector<64x128xf32> -> vector<64x128xf32>
    %74 = arith.addf %65, %73 : vector<64x128xf32>
    %c1_i32_54 = arith.constant 1 : i32
    %75 = arith.addi %1, %c1_i32_54 : i32
    %c0_55 = arith.constant 0 : index
    %76 = arith.index_cast %75 : i32 to index
    %c1_56 = arith.constant 1 : index
    %c0_57 = arith.constant 0 : index
    %77 = vector.load %arg2[%c0_55, %76, %c1_56, %c0_57] : memref<1x9x9x4xbf16, #tpu.memory_space<vmem>>, vector<1x8x8x4xbf16>
    %78 = vector.shape_cast %77 : vector<1x8x8x4xbf16> to vector<8x8x4xbf16>
    %79 = vector.shape_cast %78 : vector<8x8x4xbf16> to vector<64x4xbf16>
    %c8 = arith.constant 8 : index
    %c0_58 = arith.constant 0 : index
    %c0_59 = arith.constant 0 : index
    %80 = vector.load %arg6[%c8, %c0_58, %c0_59] : memref<9x4x128xbf16, #tpu.memory_space<vmem>>, vector<1x4x128xbf16>
    %81 = vector.shape_cast %80 : vector<1x4x128xbf16> to vector<4x128xbf16>
    %cst_60 = arith.constant dense<0.000000e+00> : vector<64x128xf32>
    %82 = tpu.matmul %79, %81, %cst_60 {dimension_numbers = #tpu.dot_dimension_numbers<[1], [0], [0], [1], [0, 0, 1, 1], [], []>} : vector<64x4xbf16>, vector<4x128xbf16>, vector<64x128xf32> -> vector<64x128xf32>
    %83 = arith.addf %74, %82 : vector<64x128xf32>
    %cst_61 = arith.constant dense<0.000000e+00> : vector<128xf32>
    %84 = vector.multi_reduction <add>, %83, %cst_61 [0] : vector<64x128xf32> to vector<128xf32>
    %85 = vector.shape_cast %84 : vector<128xf32> to vector<1x128xf32>
    %c0_62 = arith.constant 0 : index
    %c0_63 = arith.constant 0 : index
    %c0_64 = arith.constant 0 : index
    %c0_65 = arith.constant 0 : index
    %86 = vector.load %arg7[%c0_62, %c0_63, %c0_64, %c0_65] : memref<1x1x2x128xf32, #tpu.memory_space<vmem>>, vector<1x1x1x128xf32>
    %87 = vector.shape_cast %86 : vector<1x1x1x128xf32> to vector<1x128xf32>
    %88 = vector.shape_cast %85 : vector<1x128xf32> to vector<1x1x1x128xf32>
    tpu.vector_store %arg7[%c0_62, %c0_63, %c0_64, %c0_65], %88 {strides = array<i32>} : memref<1x1x2x128xf32, #tpu.memory_space<vmem>>, vector<1x1x1x128xf32>,
    %89 = arith.mulf %83, %83 : vector<64x128xf32>
    %cst_66 = arith.constant dense<0.000000e+00> : vector<128xf32>
    %90 = vector.multi_reduction <add>, %89, %cst_66 [0] : vector<64x128xf32> to vector<128xf32>
    %91 = vector.shape_cast %90 : vector<128xf32> to vector<1x128xf32>
    %c0_67 = arith.constant 0 : index
    %c0_68 = arith.constant 0 : index
    %c1_69 = arith.constant 1 : index
    %c0_70 = arith.constant 0 : index
    %92 = vector.load %arg7[%c0_67, %c0_68, %c1_69, %c0_70] : memref<1x1x2x128xf32, #tpu.memory_space<vmem>>, vector<1x1x1x128xf32>
    %93 = vector.shape_cast %92 : vector<1x1x1x128xf32> to vector<1x128xf32>
    %94 = vector.shape_cast %91 : vector<1x128xf32> to vector<1x1x1x128xf32>
    tpu.vector_store %arg7[%c0_67, %c0_68, %c1_69, %c0_70], %94 {strides = array<i32>} : memref<1x1x2x128xf32, #tpu.memory_space<vmem>>, vector<1x1x1x128xf32>,
    return
  }
  func.func @transform_0(%arg0: i32, %arg1: i32) -> (i32, i32, i32, i32) {
    %c0_i32 = arith.constant 0 : i32
    %c0_i32_0 = arith.constant 0 : i32
    %c0_i32_1 = arith.constant 0 : i32
    %c0_i32_2 = arith.constant 0 : i32
    return %arg0, %c0_i32, %c0_i32_0, %c0_i32_1 : i32, i32, i32, i32
  }
  func.func @transform_1(%arg0: i32, %arg1: i32) -> (i32, i32, i32, i32) {
    %c0_i32 = arith.constant 0 : i32
    %c0_i32_0 = arith.constant 0 : i32
    %c0_i32_1 = arith.constant 0 : i32
    %c0_i32_2 = arith.constant 0 : i32
    return %arg0, %c0_i32, %c0_i32_0, %c0_i32_1 : i32, i32, i32, i32
  }
  func.func @transform_2(%arg0: i32, %arg1: i32) -> (i32, i32, i32, i32) {
    %c0_i32 = arith.constant 0 : i32
    %c0_i32_0 = arith.constant 0 : i32
    %c0_i32_1 = arith.constant 0 : i32
    %c0_i32_2 = arith.constant 0 : i32
    return %arg0, %c0_i32, %c0_i32_0, %c0_i32_1 : i32, i32, i32, i32
  }
  func.func @transform_3(%arg0: i32, %arg1: i32) -> (i32, i32, i32, i32) {
    %c0_i32 = arith.constant 0 : i32
    %c0_i32_0 = arith.constant 0 : i32
    %c0_i32_1 = arith.constant 0 : i32
    %c0_i32_2 = arith.constant 0 : i32
    return %arg0, %c0_i32, %c0_i32_0, %c0_i32_1 : i32, i32, i32, i32
  }
  func.func @transform_4(%arg0: i32, %arg1: i32) -> (i32, i32, i32) {
    %c0_i32 = arith.constant 0 : i32
    %c0_i32_0 = arith.constant 0 : i32
    %c0_i32_1 = arith.constant 0 : i32
    %c0_i32_2 = arith.constant 0 : i32
    return %c0_i32, %c0_i32_0, %c0_i32_1 : i32, i32, i32
  }
  func.func @transform_5(%arg0: i32, %arg1: i32) -> (i32, i32, i32, i32) {
    %c0_i32 = arith.constant 0 : i32
    %c0_i32_0 = arith.constant 0 : i32
    %c0_i32_1 = arith.constant 0 : i32
    return %arg0, %arg1, %c0_i32, %c0_i32_0 : i32, i32, i32, i32
  }
}

</mosaic_0001>

<bundles_post_ra>
// kernel: tpu_custom_call.1
= control target key start
LH: loop header
LB: loop body
LE: loop exit
PB: predicated region body
PF: predicated region fallthrough
CT: control target
= control target key end

     0   :  { %10 = vsyncpa [#allocation3], 0  ;;  %s2769_s0 = inlined_call_operand.vmem [shape: bf16[2,9,9,4], index: 0, kind: input, shape index: {}]   ;;  %s2770_s1 = inlined_call_operand.vmem [shape: bf16[2,9,9,4], index: 1, kind: input, shape index: {}]   ;;  %s2771_s2 = inlined_call_operand.vmem [shape: bf16[2,9,9,4], index: 2, kind: input, shape index: {}]   ;;  %s2772_s3 = inlined_call_operand.vmem [shape: bf16[2,9,9,4], index: 3, kind: input, shape index: {}]   ;;  %s2773_s4 = inlined_call_operand.vmem [shape: bf16[9,4,128], index: 4, kind: input, shape index: {}]   ;;  %s2774_s5 = inlined_call_operand.hbm [shape: f32[2,1,2,128], index: 5, kind: output, shape index: {}]  }
   0x1   :  { %12 = vsyncpa [#allocation3 + $0x1], 0  ;;  %s2399_s18 = smov 0   ;;  %s2401_s19 = smov 0  }
   0x2   :  { %s2403_s20 = smov 0   ;;  %s2405_s21 = smov 0  }
   0x3   :  { %s2407_s22 = smov 0   ;;  %s2409_s23 = smov 0  }
   0x4 LB: > { %s1871_s24 = sadd.s32 4294967295, %s2366_s23   ;;  %s1872_s25 = sadd.s32 4294967294, %s2366_s23   ;;  %s2366_s23 = sphi %s2409_s23, %s18_s23   ;;  %s2362_s22 = sphi %s2407_s22, %s2783_s22   ;;  %s2358_s21 = sphi %s2405_s21, %s2782_s21   ;;  %s2354_s20 = sphi %s2403_s20, %s2781_s20   ;;  %s2350_s19 = sphi %s2401_s19, %s2780_s19   ;;  %s2346_s18 = sphi %s2399_s18, %s2779_s18  }
   0x5   : > { %s30_s26 = sadd.s32 1, %s2362_s22  ;;  %s164_s27 = sadd.s32 1, %s2354_s20 }
   0x6   : > { %p32_p0 = scmp.ge.s32.totalorder %s30_s26, 2  ;;  %p174_p1 = scmp.ne.s32.totalorder %s2354_s20, %s2350_s19 }
   0x7   : > { %p175_p2 = scmp.eq.s32.totalorder %s1871_s24, 1  ;;  %p180_p3 = scmp.ne.s32.totalorder %s2350_s19, %s2346_s18 }
   0x8   : > { %s2785_s26 = smov (%p32_p0, %s30_s26), 0  ;;  %p181_p5 = scmp.eq.s32.totalorder %s1872_s25, 1 }
   0x9   : > { %p2439_p4 = por %p175_p2, %p174_p1  ;;  %s159_s29 = ssub.s32 %s2362_s22, %s2785_s26 }
   0xa   : > { %p1875_p6 = scmp.ge.s32.totalorder %s2366_s23, 1  ;;  %p162_p7 = scmp.eq.s32.totalorder %s159_s29, 0 }
   0xb   : > { %p2446_p8 = por %p181_p5, %p180_p3  ;;  %p234_p9 = scmp.lt.s32.totalorder %s2366_s23, 3 }
   0xc   : > { %s2452_s6 = scalar_select %p162_p7, %s2354_s20, %s164_s27  }
   0xd   : > { %p235_p10 = pnand %p1875_p6, %p234_p9 }
   0xe   : > { %v1881_v0 = vld [vmem:[%s2773_s4 + $0x2] sm:$0x3] (!%p235_p10)  ;;  %vm356_vm0 = vcmask (!%p235_p10), 1041408   ;;  %v2460_v1 = vld [vmem:[%s2773_s4 + $0x8] sm:$0x3] (!%p235_p10)  ;;  %p277_p11 = scmp.lt.s32.totalorder (!%p235_p10), %s2358_s21, 1 }
   0xf   : > { %238 = sbr.rel (%p235_p10) target bundleno = 355 (0x163), region = 40  ;;  %2198 = vmatprep.subr.msk.bf16.mxu1 (!%p235_p10), %vm356_vm0, %v1881_v0  ;;  %2202 = vmatprep.subr.msk.bf16.mxu0 (!%p235_p10), %vm356_vm0, %v2460_v1  ;;  %v358_v2 = vsel (!%p235_p10), %vm356_vm0, %v1881_v0, 0  ;;  %v2469_v3 = vsel (!%p235_p10), %vm356_vm0, %v2460_v1, 0  ;;  %v310_v4 = vld [vmem:[%s2773_s4] sm:$0x3] (!%p235_p10)  ;;  %vm343_vm1 = vcmask (!%p235_p10), 31744  }
  0x10   : > { %2043 = vmatpush3.bf16.msra.mxu1 (!%p235_p10), %v358_v2  ;;  %2083 = vmatpush3.bf16.msra.mxu0 (!%p235_p10), %v2469_v3  ;;  %v1925_v5 = vld [vmem:[%s2773_s4 + $0xa] sm:$0x3] (!%p235_p10)  ;;  %v458_v6 = vsel (!%p235_p10), %vm356_vm0, %v310_v4, 0  ;;  %v1942_v9 = vld [vmem:[%s2773_s4 + $0xc] sm:$0x3] (!%p235_p10)  ;;  %s1994_s11 = sshll.u32 (!%p235_p10), %s2358_s21, 5 }
  0x11   : > { %2199 = vmatprep.subr.msk.bf16.mxu1 (!%p235_p10), %vm356_vm0, %v310_v4  ;;  %2204 = vmatprep.subr.msk.bf16.mxu0 (!%p235_p10), %vm356_vm0, %v1925_v5  ;;  %v1153_v7 = vsel (!%p235_p10), %vm356_vm0, %v1925_v5, 0  ;;  %v1898_v10 = vld [vmem:[%s2773_s4 + $0x4] sm:$0x3] (!%p235_p10)  ;;  %vm541_vm2 = vsmask.f32 (!%p235_p10), 3328  ;;  %v2519_v15 = vsel (!%p235_p10), %vm356_vm0, %v1942_v9, 0  ;;  %s2722_s17 = scalar_lea.hbm (!%p235_p10), %s2774_s5, %s1994_s11 }
  0x12   : > { %vm542_vm3 = vsmask.f32 (!%p235_p10), 7440  ;;  %v2522_v16 = vsel (!%p235_p10), %vm356_vm0, %v1898_v10, 0 }
  0x13   : > { %vm2545_vm4 = vmor (!%p235_p10), %vm541_vm2, %vm542_vm3 }
  0x16   : > { %s278_s13 = scalar_select %p277_p11, %s2358_s21, 1 }
  0x17   : > { %s2368_s21 = smov [#allocation2]  }
  0x18   : > { %s2481_s16 = smul.u32 72, %s278_s13  ;;  %s2292_s27 = sshll.u32 %s2368_s21, 4  ;;  %s2293_s27 = int_to_ptr.vmem [resolvable:$false] %s2292_s27 }
  0x19   : > { %s2294_s29 = scalar_lea.vmem %s2293_s27, 64 }
  0x1a   : > { %s2487_s25 = scalar_lea.vmem %s2770_s1, %s2481_s16  ;;  %s2496_s7 = scalar_lea.vmem %s2772_s3, %s2481_s16 }
  0x1b   : > { %v2264_v8 = vld [vmem:[%s2487_s25] ss:$8 sps:$4 sm:$0xff]   ;;  %v2266_v12 = vld [vmem:[%s2487_s25 + $0x10] ss:$8 sps:$4 sm:$0xff]   ;;  %s2511_s14 = scalar_lea.vmem %s2771_s2, %s2481_s16  ;;  %s2539_s24 = scalar_lea.vmem %s2769_s0, %s2481_s16 }
  0x1c   : > { %v2265_v11 = vld [vmem:[%s2496_s7] ss:$8 sps:$4 sm:$0xff]   ;;  %2044 = vmatprep.mubr.msk.bf16.mxu1 %vm343_vm1, %v2264_v8  ;;  %v2267_v13 = vld [vmem:[%s2496_s7 + $0x10] ss:$8 sps:$4 sm:$0xff]   ;;  %v999_v19 = vld [vmem:[%s2511_s14 + $0x4] sm:$0x1] }
  0x1d   : > { %2084 = vmatprep.mubr.msk.bf16.mxu0 %vm343_vm1, %v2265_v11  ;;  %2045 = vmatmul.mubr.msk.bf16.vlgmr.msra.gmra.mrb[0].mxu1 %vm343_vm1, %v2266_v12  ;;  %v2268_v14 = vld [vmem:[%s2487_s25 + $0x20] ss:$8 sps:$4 sm:$0xff]   ;;  %v2269_v17 = vld [vmem:[%s2487_s25 + $0x30] ss:$8 sps:$4 sm:$0xff]   ;;  %v1001_v21 = vld [vmem:[%s2511_s14 + $0xc] sm:$0x1] }
  0x1e   : > { %2053 = vmatpush3.bf16.msra.mxu1 %v458_v6  ;;  %2085 = vmatmul.mubr.msk.bf16.vlgmr.msra.gmra.mrb[0].mxu0 %vm343_vm1, %v2267_v13  ;;  %v998_v18 = vld [vmem:[%s2511_s14] sm:$0xf]  ;;  %v1000_v20 = vld [vmem:[%s2511_s14 + $0x8] sm:$0xf]  ;;  %v1024_v24 = vshll.u32 %v999_v19, 16  ;;  %v1038_v27 = vshll.u32 %v1001_v21, 16 }
  0x1f   : > { %2093 = vmatpush3.bf16.msra.mxu0 %v1153_v7  ;;  %2048 = vmatprep.mubr.msk.bf16.mxu1 %vm343_vm1, %v2268_v14  ;;  %v1015_v22 = vshrl.u32 %v998_v18, 16  ;;  %v1018_v23 = vshll.u32 %v998_v18, 16  ;;  %v1029_v25 = vshrl.u32 %v1000_v20, 16  ;;  %v1032_v26 = vshll.u32 %v1000_v20, 16  ;;  %v1002_v28 = vld [vmem:[%s2511_s14 + $0x10] sm:$0xf] }
  0x20   : > { %2205 = vmatprep.subr.msk.bf16.mxu0 %vm356_vm0, %v1942_v9  ;;  %2200 = vmatprep.subr.msk.bf16.mxu1 %vm356_vm0, %v1898_v10  ;;  %v1003_v29 = vld [vmem:[%s2511_s14 + $0x14] sm:$0x1]  ;;  %v1026_v32 = vrot.slane %v1024_v24, 5  ;;  %v1004_v34 = vld [vmem:[%s2511_s14 + $0x18] sm:$0xf]  ;;  %v1040_v36 = vrot.slane %v1038_v27, 5 }
  0x21   : > { %v1017_v30 = vrot.slane %v1015_v22, 4  ;;  %v1020_v31 = vrot.slane %v1018_v23, 5  ;;  %v1031_v33 = vrot.slane %v1029_v25, 4  ;;  %v1034_v35 = vrot.slane %v1032_v26, 5  ;;  %v1005_v37 = vld [vmem:[%s2511_s14 + $0x1c] sm:$0x1] }
  0x22   : > { %v1043_v38 = vshrl.u32 %v1002_v28, 16  ;;  %v1046_v39 = vshll.u32 %v1002_v28, 16  ;;  %v1052_v41 = vshll.u32 %v1003_v29, 16  ;;  %v1057_v42 = vshrl.u32 %v1004_v34, 16  ;;  %v2270_v53 = vld [vmem:[%s2539_s24] ss:$8 sps:$4 sm:$0xff]  }
  0x23   : > { %v1021_v40 = vor.u32 %v1020_v31, %v1017_v30  ;;  %v1060_v43 = vshll.u32 %v1004_v34, 16  ;;  %v1035_v45 = vor.u32 %v1034_v35, %v1031_v33  ;;  %v1066_v48 = vshll.u32 %v1005_v37, 16  ;;  %v2271_v59 = vld [vmem:[%s2539_s24 + $0x10] ss:$8 sps:$4 sm:$0xff]   ;;  %v1006_v60 = vld [vmem:[%s2511_s14 + $0x20] sm:$0xf] }
  0x24   : > { %v1045_v46 = vrot.slane %v1043_v38, 4  ;;  %v1048_v47 = vrot.slane %v1046_v39, 5  ;;  %v1054_v50 = vrot.slane %v1052_v41, 5  ;;  %v1059_v51 = vrot.slane %v1057_v42, 4  ;;  %v1007_v61 = vld [vmem:[%s2511_s14 + $0x24] sm:$0x1] }
  0x25   : > { %2049 = vmatmul.mubr.msk.bf16.gmra.mrb[4].mxu1 %vm343_vm1, %v2269_v17  ;;  %v1022_v49 = vrot.slane %v1021_v40, 4  ;;  %v1062_v52 = vrot.slane %v1060_v43, 5  ;;  %v1036_v54 = vrot.slane %v1035_v45, 4  ;;  %v1068_v56 = vrot.slane %v1066_v48, 5  ;;  %v1008_v0 = vld [vmem:[%s2511_s14 + $0x28] sm:$0xf] }
  0x26   : > { %v1049_v55 = vor.u32 %v1048_v47, %v1045_v46  ;;  %2054 = vmatprep.mubr.msk.bf16.mxu1 %vm343_vm1, %v2270_v53  ;;  %v1009_v2 = vld [vmem:[%s2511_s14 + $0x2c] sm:$0x1]  ;;  %v1071_v4 = vshrl.u32 %v1006_v60, 16  ;;  %v1074_v7 = vshll.u32 %v1006_v60, 16  ;;  %v1080_v8 = vshll.u32 %v1007_v61, 16 }
  0x27   : > { %v1027_v57 = vsel %vm2545_vm4, %v1022_v49, %v1026_v32  ;;  %v1063_v58 = vor.u32 %v1062_v52, %v1059_v51  ;;  %v1041_v62 = vsel %vm2545_vm4, %v1036_v54, %v1040_v36  ;;  %v1010_v9 = vld [vmem:[%s2511_s14 + $0x30] sm:$0xf]  ;;  %v2564_v10 = vld [vmem:[%s2773_s4 + $0x6] sm:$0x3]  ;;  %v1085_v13 = vshrl.u32 %v1008_v0, 16 }
  0x28   : > { %v1050_v63 = vrot.slane %v1049_v55, 4  ;;  %v1926_v5 = vcombine.low %v1027_v57, %v1041_v62  ;;  %v1073_v12 = vrot.slane %v1071_v4, 4  ;;  %v1088_v14 = vshll.u32 %v1008_v0, 16  ;;  %v1011_v17 = vld [vmem:[%s2511_s14 + $0x34] sm:$0x1] }
  0x29   : > { %v1064_v6 = vrot.slane %v1063_v58, 4  ;;  %v1076_v19 = vrot.slane %v1074_v7, 5  ;;  %v1082_v20 = vrot.slane %v1080_v8, 5  ;;  %v1094_v21 = vshll.u32 %v1009_v2, 16  ;;  %v1012_v22 = vld [vmem:[%s2511_s14 + $0x38] sm:$0xf] }
  0x2a   : > { %v1055_v11 = vsel %vm2545_vm4, %v1050_v63, %v1054_v50  ;;  %2094 = vmatprep.mubr.msk.bf16.mxu0 %vm343_vm1, %v1926_v5  ;;  %v2576_v23 = vld [vmem:[%s2773_s4 + $0xe] sm:$0x3]  ;;  %v1087_v25 = vrot.slane %v1085_v13, 4  ;;  %v1090_v26 = vrot.slane %v1088_v14, 5  ;;  %v1013_v27 = vld [vmem:[%s2511_s14 + $0x3c] sm:$0x1] }
  0x2b   : > { %v1069_v18 = vsel %vm2545_vm4, %v1064_v6, %v1068_v56  ;;  %v1099_v28 = vshrl.u32 %v1010_v9, 16  ;;  %v1077_v29 = vor.u32 %v1076_v19, %v1073_v12  ;;  %v1096_v30 = vrot.slane %v1094_v21, 5  ;;  %v2274_v53 = vld [vmem:[%s2539_s24 + $0x8] ss:$8 sps:$4 sm:$0xff]   ;;  %v525_v54 = vld [vmem:[%s2539_s24] sm:$0xf] }
  0x2c   : > { %v1927_v24 = vcombine.low %v1055_v11, %v1069_v18  ;;  %v1102_v31 = vshll.u32 %v1010_v9, 16  ;;  %v1108_v32 = vshll.u32 %v1011_v17, 16  ;;  %v1091_v33 = vor.u32 %v1090_v26, %v1087_v25  ;;  %v526_v56 = vld [vmem:[%s2539_s24 + $0x4] sm:$0x1]  ;;  %v527_v57 = vld [vmem:[%s2539_s24 + $0x8] sm:$0xf] }
  0x2d   : > { %2055 = vmatmul.mubr.msk.bf16.vlgmr.msra.gmra.mrb[0].mxu1 %vm343_vm1, %v2271_v59  ;;  %v1101_v34 = vrot.slane %v1099_v28, 4  ;;  %v1113_v35 = vshrl.u32 %v1012_v22, 16  ;;  %v1116_v36 = vshll.u32 %v1012_v22, 16  ;;  %v1078_v37 = vrot.slane %v1077_v29, 4  ;;  %v528_v58 = vld [vmem:[%s2539_s24 + $0xc] sm:$0x1] }
  0x2e   : > { %2063 = vmatpush3.bf16.msra.mxu1 %v2522_v16  ;;  %2095 = vmatmul.mubr.msk.bf16.vlgmr.msra.gmra.mrb[0].mxu0 %vm343_vm1, %v1927_v24  ;;  %v1104_v38 = vrot.slane %v1102_v31, 5  ;;  %v1122_v39 = vshll.u32 %v1013_v27, 16  ;;  %v2272_v16 = vld [vmem:[%s2539_s24 + $0x20] ss:$8 sps:$4 sm:$0xff]   ;;  %v1092_v40 = vrot.slane %v1091_v33, 4  ;;  %v1110_v46 = vrot.slane %v1108_v32, 5 }
  0x2f   : > { %2201 = vmatprep.subr.msk.bf16.mxu1 %vm356_vm0, %v2564_v10  ;;  %2103 = vmatpush3.bf16.msra.mxu0 %v2519_v15  ;;  %v1115_v41 = vrot.slane %v1113_v35, 4  ;;  %v1118_v42 = vrot.slane %v1116_v36, 5  ;;  %v1083_v43 = vsel %vm2545_vm4, %v1078_v37, %v1082_v20  ;;  %v2273_v15 = vld [vmem:[%s2539_s24 + $0x30] ss:$8 sps:$4 sm:$0xff]   ;;  %v545_v60 = vshrl.u32 %v525_v54, 16 }
  0x30   : > { %2206 = vmatprep.subr.msk.bf16.mxu0 %vm356_vm0, %v2576_v23  ;;  %v1105_v45 = vor.u32 %v1104_v38, %v1101_v34  ;;  %2058 = vmatprep.mubr.msk.bf16.mxu1 %vm343_vm1, %v2272_v16  ;;  %v1097_v47 = vsel %vm2545_vm4, %v1092_v40, %v1096_v30  ;;  %v1124_v49 = vrot.slane %v1122_v39, 5  ;;  %v548_v61 = vshll.u32 %v525_v54, 16  ;;  %v529_v63 = vld [vmem:[%s2539_s24 + $0x10] sm:$0xf]  ;;  %v530_v6 = vld [vmem:[%s2539_s24 + $0x14] sm:$0x1] }
  0x31   : > { %v1119_v48 = vor.u32 %v1118_v42, %v1115_v41  ;;  %v1928_v50 = vcombine.low %v1083_v43, %v1097_v47  ;;  %v554_v62 = vshll.u32 %v526_v56, 16  ;;  %v559_v2 = vshrl.u32 %v527_v57, 16  ;;  %v531_v11 = vld [vmem:[%s2539_s24 + $0x18] sm:$0xf]  ;;  %v532_v18 = vld [vmem:[%s2539_s24 + $0x1c] sm:$0x1] }
  0x32   : > { %v1106_v51 = vrot.slane %v1105_v45, 4  ;;  %v562_v4 = vshll.u32 %v527_v57, 16  ;;  %v568_v5 = vshll.u32 %v528_v58, 16  ;;  %v547_v7 = vrot.slane %v545_v60, 4  ;;  %v2275_v29 = vld [vmem:[%s2539_s24 + $0x18] ss:$8 sps:$4 sm:$0xff]  }
  0x33   : > { %v1120_v52 = vrot.slane %v1119_v48, 4  ;;  %2098 = vmatprep.mubr.msk.bf16.mxu0 %vm343_vm1, %v1928_v50  ;;  %v550_v8 = vrot.slane %v548_v61, 5  ;;  %v556_v9 = vrot.slane %v554_v62, 5  ;;  %v573_v12 = vshrl.u32 %v529_v63, 16  ;;  %v2276_v37 = vld [vmem:[%s2539_s24 + $0x28] ss:$8 sps:$4 sm:$0xff]  }
  0x34   : > { %v1111_v55 = vsel %vm2545_vm4, %v1106_v51, %v1110_v46  ;;  %v561_v13 = vrot.slane %v559_v2, 4  ;;  %v564_v14 = vrot.slane %v562_v4, 5  ;;  %v570_v17 = vrot.slane %v568_v5, 5  ;;  %v533_v40 = vld [vmem:[%s2539_s24 + $0x20] sm:$0xf] }
  0x35   : > { %2059 = vmatmul.mubr.msk.bf16.gmra.mrb[4].mxu1 %vm343_vm1, %v2273_v15  ;;  %v1125_v59 = vsel %vm2545_vm4, %v1120_v52, %v1124_v49  ;;  %v576_v19 = vshll.u32 %v529_v63, 16  ;;  %v551_v20 = vor.u32 %v550_v8, %v547_v7  ;;  %v575_v21 = vrot.slane %v573_v12, 4  ;;  %v534_v45 = vld [vmem:[%s2539_s24 + $0x24] sm:$0x1]  ;;  %v535_v46 = vld [vmem:[%s2539_s24 + $0x28] sm:$0xf] }
  0x36   : > { %v1929_v0 = vcombine.low %v1111_v55, %v1125_v59  ;;  %v582_v22 = vshll.u32 %v530_v6, 16  ;;  %v587_v24 = vshrl.u32 %v531_v11, 16  ;;  %v565_v25 = vor.u32 %v564_v14, %v561_v13  ;;  %v536_v48 = vld [vmem:[%s2539_s24 + $0x2c] sm:$0x1]  ;;  %v537_v55 = vld [vmem:[%s2539_s24 + $0x30] sm:$0xf] }
  0x37   : > { %v578_v26 = vrot.slane %v576_v19, 5  ;;  %v590_v27 = vshll.u32 %v531_v11, 16  ;;  %v596_v28 = vshll.u32 %v532_v18, 16  ;;  %v1395_v30 = vsel %vm356_vm0, %v2576_v23, 0  ;;  %v2623_v23 = vld [vmem:[%s2773_s4 + $0x10] sm:$0x3] }
  0x38   : > { %2099 = vmatmul.mubr.msk.bf16.gmra.mrb[4].mxu0 %vm343_vm1, %v1929_v0  ;;  %v552_v31 = vrot.slane %v551_v20, 4  ;;  %v584_v32 = vrot.slane %v582_v22, 5  ;;  %v589_v33 = vrot.slane %v587_v24, 4  ;;  %v566_v34 = vrot.slane %v565_v25, 4  ;;  %v538_v60 = vld [vmem:[%s2539_s24 + $0x34] sm:$0x1] }
  0x39   : > { %2104 = vmatprep.mubr.msk.bf16.mxu0 %vm343_vm1, %v2274_v53  ;;  %v579_v35 = vor.u32 %v578_v26, %v575_v21  ;;  %v592_v36 = vrot.slane %v590_v27, 5  ;;  %v598_v39 = vrot.slane %v596_v28, 5  ;;  %v803_v16 = vsel %vm356_vm0, %v2564_v10, 0  ;;  %v2277_v62 = vld [vmem:[%s2539_s24 + $0x38] ss:$8 sps:$4 sm:$0xff]  }
  0x3a   : > { %v557_v38 = vsel %vm2545_vm4, %v552_v31, %v556_v9  ;;  %v571_v41 = vsel %vm2545_vm4, %v566_v34, %v570_v17  ;;  %v601_v15 = vshrl.u32 %v533_v40, 16  ;;  %v604_v49 = vshll.u32 %v533_v40, 16  ;;  %v539_v0 = vld [vmem:[%s2539_s24 + $0x38] sm:$0xf]  ;;  %v540_v2 = vld [vmem:[%s2539_s24 + $0x3c] sm:$0x1] }
  0x3b   : > { %v580_v42 = vrot.slane %v579_v35, 4  ;;  %v593_v43 = vor.u32 %v592_v36, %v589_v33  ;;  %v1899_v47 = vcombine.low %v557_v38, %v571_v41  ;;  %v610_v10 = vshll.u32 %v534_v45, 16  ;;  %v2278_v14 = vld [vmem:[%s2487_s25 + $0x8] ss:$8 sps:$4 sm:$0xff]   ;;  %v2279_v35 = vld [vmem:[%s2487_s25 + $0x18] ss:$8 sps:$4 sm:$0xff]  }
  0x3c   : > { %v615_v50 = vshrl.u32 %v535_v46, 16  ;;  %v603_v53 = vrot.slane %v601_v15, 4  ;;  %v618_v54 = vshll.u32 %v535_v46, 16  ;;  %v606_v56 = vrot.slane %v604_v49, 5  ;;  %v1969_v40 = vld [vmem:[%s2539_s24 + $0xc] sm:$0x1] }
  0x3d   : > { %v585_v51 = vsel %vm2545_vm4, %v580_v42, %v584_v32  ;;  %v594_v52 = vrot.slane %v593_v43, 4  ;;  %2064 = vmatprep.mubr.msk.bf16.mxu1 %vm343_vm1, %v1899_v47  ;;  %v612_v57 = vrot.slane %v610_v10, 5  ;;  %v624_v59 = vshll.u32 %v536_v48, 16  ;;  %v1970_v41 = vld [vmem:[%s2539_s24 + $0x10] sm:$0xf] }
  0x3e   : > { %v617_v58 = vrot.slane %v615_v50, 4  ;;  %v620_v63 = vrot.slane %v618_v54, 5  ;;  %v629_v4 = vshrl.u32 %v537_v55, 16  ;;  %v607_v6 = vor.u32 %v606_v56, %v603_v53  ;;  %v1971_v42 = vld [vmem:[%s2539_s24 + $0x14] sm:$0x1] }
  0x3f   : > { %v599_v61 = vsel %vm2545_vm4, %v594_v52, %v598_v39  ;;  %v626_v7 = vrot.slane %v624_v59, 5  ;;  %v632_v8 = vshll.u32 %v537_v55, 16  ;;  %v638_v12 = vshll.u32 %v538_v60, 16  ;;  %v2282_v39 = vld [vmem:[%s2487_s25 + $0x28] ss:$8 sps:$4 sm:$0xff]  }
  0x40   : > { %2105 = vmatmul.mubr.msk.bf16.vlgmr.msra.gmra.mrb[0].mxu0 %vm343_vm1, %v2275_v29  ;;  %v1900_v5 = vcombine.low %v585_v51, %v599_v61  ;;  %v621_v9 = vor.u32 %v620_v63, %v617_v58  ;;  %v631_v11 = vrot.slane %v629_v4, 4  ;;  %v643_v13 = vshrl.u32 %v539_v0, 16  ;;  %v1972_v48 = vld [vmem:[%s2539_s24 + $0x18] sm:$0xf]  ;;  %v1973_v50 = vld [vmem:[%s2539_s24 + $0x1c] sm:$0x1] }
  0x41   : > { %2113 = vmatpush3.bf16.msra.mxu0 %v1395_v30  ;;  %2108 = vmatprep.mubr.msk.bf16.mxu0 %vm343_vm1, %v2276_v37  ;;  %v608_v17 = vrot.slane %v607_v6, 4  ;;  %v634_v18 = vrot.slane %v632_v8, 5  ;;  %v646_v19 = vshll.u32 %v539_v0, 16  ;;  %v652_v20 = vshll.u32 %v540_v2, 16  ;;  %v2280_v37 = vld [vmem:[%s2511_s14] ss:$8 sps:$4 sm:$0xff]  }
  0x42   : > { %2207 = vmatprep.subr.msk.bf16.mxu0 %vm356_vm0, %v2623_v23  ;;  %2065 = vmatmul.mubr.msk.bf16.vlgmr.msra.gmra.mrb[0].mxu1 %vm343_vm1, %v1900_v5  ;;  %v622_v21 = vrot.slane %v621_v9, 4  ;;  %v645_v22 = vrot.slane %v643_v13, 4  ;;  %v640_v26 = vrot.slane %v638_v12, 5  ;;  %v1625_v34 = vsel %vm356_vm0, %v2623_v23, 0  ;;  %v1974_v51 = vld [vmem:[%s2539_s24 + $0x20] sm:$0xf] }
  0x43   : > { %2073 = vmatpush3.bf16.msra.mxu1 %v803_v16  ;;  %v613_v24 = vsel %vm2545_vm4, %v608_v17, %v612_v57  ;;  %v635_v25 = vor.u32 %v634_v18, %v631_v11  ;;  %v648_v27 = vrot.slane %v646_v19, 5  ;;  %v654_v32 = vrot.slane %v652_v20, 5  ;;  %v1968_v16 = vld [vmem:[%s2539_s24 + $0x8] sm:$0xf]  ;;  %v2281_v52 = vld [vmem:[%s2511_s14 + $0x10] ss:$8 sps:$4 sm:$0xff]  }
  0x44   : > { %2203 = vmatprep.subr.msk.bf16.mxu1 %vm356_vm0, %v2460_v1  ;;  %v627_v28 = vsel %vm2545_vm4, %v622_v21, %v626_v7  ;;  %v1487_v43 = vshrl.u32 %v1968_v16, 16  ;;  %v1490_v45 = vshll.u32 %v1968_v16, 16  ;;  %v1496_v23 = vshll.u32 %v1969_v40, 16  ;;  %v2283_v53 = vld [vmem:[%s2487_s25 + $0x38] ss:$8 sps:$4 sm:$0xff]   ;;  %s274_s25 = sand.u32 1, %s2350_s19  }
  0x45   : > { %v1901_v29 = vcombine.low %v613_v24, %v627_v28  ;;  %v636_v30 = vrot.slane %v635_v25, 4  ;;  %v649_v31 = vor.u32 %v648_v27, %v645_v22  ;;  %v1501_v46 = vshrl.u32 %v1970_v41, 16  ;;  %v1975_v58 = vld [vmem:[%s2539_s24 + $0x24] sm:$0x1]  ;;  %v2284_v5 = vld [vmem:[%s2511_s14 + $0x20] ss:$8 sps:$4 sm:$0xff]  }
  0x46   : > { %v1504_v15 = vshll.u32 %v1970_v41, 16  ;;  %v1510_v47 = vshll.u32 %v1971_v42, 16  ;;  %v1489_v49 = vrot.slane %v1487_v43, 4  ;;  %v1492_v10 = vrot.slane %v1490_v45, 5  ;;  %v1976_v17 = vld [vmem:[%s2539_s24 + $0x28] sm:$0xf] }
  0x47   : > { %2068 = vmatprep.mubr.msk.bf16.mxu1 %vm343_vm1, %v1901_v29  ;;  %v641_v1 = vsel %vm2545_vm4, %v636_v30, %v640_v26  ;;  %v650_v33 = vrot.slane %v649_v31, 4  ;;  %v1498_v54 = vrot.slane %v1496_v23, 5  ;;  %v1503_v55 = vrot.slane %v1501_v46, 4  ;;  %v1977_v20 = vld [vmem:[%s2539_s24 + $0x2c] sm:$0x1] }
  0x48   : > { %2109 = vmatmul.mubr.msk.bf16.gmra.mrb[4].mxu0 %vm343_vm1, %v2277_v62  ;;  %v1506_v56 = vrot.slane %v1504_v15, 5  ;;  %v1512_v57 = vrot.slane %v1510_v47, 5  ;;  %v1493_v59 = vor.u32 %v1492_v10, %v1489_v49  ;;  %v1515_v60 = vshrl.u32 %v1972_v48, 16  ;;  %v1978_v21 = vld [vmem:[%s2539_s24 + $0x30] sm:$0xf] }
  0x49   : > { %2114 = vmatprep.mubr.msk.bf16.mxu0 %vm343_vm1, %v2278_v14  ;;  %v655_v36 = vsel %vm2545_vm4, %v650_v33, %v654_v32  ;;  %v1518_v61 = vshll.u32 %v1972_v48, 16  ;;  %v1524_v62 = vshll.u32 %v1973_v50, 16  ;;  %v1529_v0 = vshrl.u32 %v1974_v51, 16  ;;  %v1979_v22 = vld [vmem:[%s2539_s24 + $0x34] sm:$0x1] }
  0x4a   : > { %v1902_v38 = vcombine.low %v641_v1, %v655_v36  ;;  %v1507_v63 = vor.u32 %v1506_v56, %v1503_v55  ;;  %v1532_v2 = vshll.u32 %v1974_v51, 16  ;;  %v1538_v4 = vshll.u32 %v1975_v58, 16  ;;  %v2285_v32 = vld [vmem:[%s2511_s14 + $0x30] ss:$8 sps:$4 sm:$0xff]   ;;  %v1981_v16 = vld [vmem:[%s2539_s24 + $0x3c] sm:$0x1] }
  0x4b   : > { %v1494_v6 = vrot.slane %v1493_v59, 4  ;;  %v1517_v7 = vrot.slane %v1515_v60, 4  ;;  %v1520_v8 = vrot.slane %v1518_v61, 5  ;;  %v1526_v9 = vrot.slane %v1524_v62, 5  ;;  %v1980_v36 = vld [vmem:[%s2539_s24 + $0x38] sm:$0xf] }
  0x4c   : > { %2069 = vmatmul.mubr.msk.bf16.gmra.mrb[4].mxu1 %vm343_vm1, %v1902_v38  ;;  %v1508_v11 = vrot.slane %v1507_v63, 4  ;;  %v1531_v12 = vrot.slane %v1529_v0, 4  ;;  %v1534_v13 = vrot.slane %v1532_v2, 5  ;;  %v1540_v14 = vrot.slane %v1538_v4, 5  ;;  %v1982_v43 = vld [vmem:[%s2539_s24 + $0x40] sm:$0xf] }
  0x4d   : > { %2074 = vmatprep.mubr.msk.bf16.mxu1 %vm343_vm1, %v2280_v37  ;;  %v1499_v18 = vsel %vm2545_vm4, %v1494_v6, %v1498_v54  ;;  %v1521_v19 = vor.u32 %v1520_v8, %v1517_v7  ;;  %v1543_v26 = vshrl.u32 %v1976_v17, 16  ;;  %v1546_v27 = vshll.u32 %v1976_v17, 16  ;;  %v1983_v45 = vld [vmem:[%s2539_s24 + $0x44] sm:$0x1]  ;;  %v2286_v15 = vld [vmem:[%s2496_s7 + $0x20] ss:$8 sps:$4 sm:$0xff]  }
  0x4e   : > { %v1513_v24 = vsel %vm2545_vm4, %v1508_v11, %v1512_v57  ;;  %v1535_v25 = vor.u32 %v1534_v13, %v1531_v12  ;;  %v1552_v30 = vshll.u32 %v1977_v20, 16  ;;  %v1557_v31 = vshrl.u32 %v1978_v21, 16  ;;  %v2287_v8 = vld [vmem:[%s2496_s7 + $0x30] ss:$8 sps:$4 sm:$0xff]   ;;  %s1876_s7 = sshll.u32 %s274_s25, 1  ;;  %s1737_s24 = scalar_lea.sflag [#allocation3], %s274_s25 }
  0x4f   : > { %v1985_v28 = vcombine.low %v1499_v18, %v1513_v24  ;;  %v1522_v29 = vrot.slane %v1521_v19, 4  ;;  %v1545_v33 = vrot.slane %v1543_v26, 4  ;;  %v1571_v23 = vshrl.u32 %v1980_v36, 16  ;;  %s276_s12 = scalar_lea.vmem [#allocation2], %s1876_s7 }
  0x50   : > { %2115 = vmatmul.mubr.msk.bf16.vlgmr.msra.gmra.mrb[0].mxu0 %vm343_vm1, %v2279_v35  ;;  %v1536_v1 = vrot.slane %v1535_v25, 4  ;;  %v1560_v35 = vshll.u32 %v1978_v21, 16  ;;  %v1554_v37 = vrot.slane %v1552_v30, 5  ;;  %v1559_v38 = vrot.slane %v1557_v31, 4  ;;  %s1751_s13 = sshll.u32 %s276_s12, 4  ;;  %s2724_s13 = int_to_ptr.vmem [resolvable:$true] %s1751_s13 }
  0x51   : > { %2123 = vmatpush3.bf16.msra.mxu0 %v1625_v34  ;;  %2118 = vmatprep.mubr.msk.bf16.mxu0 %vm343_vm1, %v2282_v39  ;;  %v1548_v34 = vrot.slane %v1546_v27, 5  ;;  %v1566_v39 = vshll.u32 %v1979_v22, 16  ;;  %v1574_v48 = vshll.u32 %v1980_v36, 16  ;;  %v1580_v49 = vshll.u32 %v1981_v16, 16  ;;  %s2288_s16 = scalar_lea.vmem %s2724_s13, 32  ;;  %p2295_p1 = scmp.lt.s32.totalorder %s2724_s13, %s2293_s27 }
  0x52   : > { %v1541_v40 = vsel %vm2545_vm4, %v1536_v1, %v1540_v14  ;;  %v1562_v42 = vrot.slane %v1560_v35, 5  ;;  %v1573_v51 = vrot.slane %v1571_v23, 4  ;;  %v1588_v54 = vshll.u32 %v1982_v43, 16  ;;  %p2289_p12 = scmp.ne.s32.totalorder %s2724_s13, %s2288_s16  ;;  %p2296_p2 = scmp.lt.s32.totalorder %s2294_s29, %s2288_s16 }
  0x53   : > { %v1549_v41 = vor.u32 %v1548_v34, %v1545_v33  ;;  %v1568_v47 = vrot.slane %v1566_v39, 5  ;;  %v1594_v55 = vshll.u32 %v1983_v45, 16  ;;  %v1582_v60 = vrot.slane %v1580_v49, 5 }
  0x54   : > { %2075 = vmatmul.mubr.msk.bf16.vlgmr.msra.gmra.mrb[0].mxu1 %vm343_vm1, %v2281_v52  ;;  %v1563_v50 = vor.u32 %v1562_v42, %v1559_v38  ;;  %v1585_v52 = vshrl.u32 %v1982_v43, 16  ;;  %v1590_v61 = vrot.slane %v1588_v54, 5  ;;  %p2290_p13 = pnand %p2289_p12, %p2439_p4  ;;  %p2297_p3 = por %p2296_p2, %p2295_p1 }
  0x55   : > { %2133 = vmatpush3.bf16.msra.mxu1 %v2469_v3  ;;  %2078 = vmatprep.mubr.msk.bf16.mxu1 %vm343_vm1, %v2284_v5  ;;  %v1527_v3 = vsel %vm2545_vm4, %v1522_v29, %v1526_v9  ;;  %v1550_v10 = vrot.slane %v1549_v41, 4  ;;  %v1596_v4 = vrot.slane %v1594_v55, 5 }
  0x56   : > { %v1986_v46 = vcombine.low %v1527_v3, %v1541_v40  ;;  %v1564_v57 = vrot.slane %v1563_v50, 4  ;;  %v1587_v58 = vrot.slane %v1585_v52, 4  ;;  %p2291_p0 = pneg %p2290_p13 }
  0x57   : > { %v1555_v56 = vsel %vm2545_vm4, %v1550_v10, %v1554_v37 }
  0x58   : > { %2119 = vmatmul.mubr.msk.bf16.gmra.mrb[4].mxu0 %vm343_vm1, %v2283_v53  ;;  %v1576_v53 = vrot.slane %v1574_v48, 5  ;;  %v1569_v62 = vsel %vm2545_vm4, %v1564_v57, %v1568_v47  ;;  %v1591_v2 = vor.u32 %v1590_v61, %v1587_v58  ;;  %p2298_p5 = pnand %p2297_p3, %p2291_p0 }
  0x59   : > { %2124 = vmatprep.mubr.msk.bf16.mxu0 %vm343_vm1, %v1985_v28  ;;  %v1987_v63 = vcombine.low %v1555_v56, %v1569_v62 }
  0x5a   : > { %v1577_v59 = vor.u32 %v1576_v53, %v1573_v51  ;;  %v1592_v6 = vrot.slane %v1591_v2, 4 }
  0x5c   : > { %2079 = vmatmul.mubr.msk.bf16.gmra.mrb[4].mxu1 %vm343_vm1, %v2285_v32  ;;  %v1578_v0 = vrot.slane %v1577_v59, 4  ;;  %v1597_v7 = vsel %vm2545_vm4, %v1592_v6, %v1596_v4 }
  0x5d   : > { %2088 = vmatprep.mubr.msk.bf16.mxu1 %vm343_vm1, %v2286_v15 }
  0x5e   : > { %v1583_v5 = vsel %vm2545_vm4, %v1578_v0, %v1582_v60 }
  0x5f   : > { %v1988_v9 = vcombine.low %v1583_v5, %v1597_v7 }
  0x60   : > { %2125 = vmatmul.mubr.msk.bf16.vlgmr.msra.gmra.mrb[0].mxu0 %vm343_vm1, %v1986_v46 }
  0x61   : > { %2128 = vmatprep.mubr.msk.bf16.mxu0 %vm343_vm1, %v1987_v63 }
  0x68   : > { %2129 = vmatmul.mubr.msk.bf16.gmra.mrb[4].mxu0 %vm343_vm1, %v1988_v9  ;;  %2089 = vmatmul.mubr.msk.bf16.vlgmr.msra.gmra.mrb[4].mxu1 %vm343_vm1, %v2287_v8 }
 0x127   : > { %v2076_v11 = vpop.f32.mrb[0].mxu1 }
 0x128   : > { %v839_v12 = vpop.f32.mrb[1].mxu1 }
 0x129   : > { %v2077_v13 = vpop.f32.mrb[2].mxu1 }
 0x12a   : > { %v842_v14 = vpop.f32.mrb[3].mxu1 }
 0x133   : > { %v2126_v17 = vpop.f32.mrb[0].mxu0 }
 0x134   : > { %v2134_v18 = vadd.f32 %v2126_v17, %v2076_v11  ;;  %v1661_v19 = vpop.f32.mrb[1].mxu0 }
 0x135   : > { %v2135_v20 = vadd.f32 %v1661_v19, %v839_v12  ;;  %v2127_v21 = vpop.f32.mrb[2].mxu0 }
 0x136   : > { %v2136_v22 = vadd.f32 %v2127_v21, %v2077_v13  ;;  %v1664_v24 = vpop.f32.mrb[3].mxu0  ;;  %v1716_v28 = vmul.f32 %v2134_v18, %v2134_v18 }
 0x137   : > { %v2137_v25 = vadd.f32 %v1664_v24, %v842_v14  ;;  %v1714_v44 = vmul.f32 %v2135_v20, %v2135_v20 }
 0x138   : > { %v1717_v31 = vmul.f32 %v2136_v22, %v2136_v22 }
 0x139   : > { %v1700_v26 = vadd.f32 %v2137_v25, %v2135_v20  ;;  %v1715_v27 = vmul.f32 %v2137_v25, %v2137_v25 }
 0x13b   : > { %v1701_v29 = vadd.f32 %v2134_v18, %v1700_v26  ;;  %v1722_v30 = vadd.f32 %v1715_v27, %v1714_v44  ;;  %v2130_v1 = vpop.f32.mrb[4].mxu0  ;;  %v2090_v35 = vpop.f32.mrb[4].mxu1 }
 0x13c   : > { %v1677_v34 = vpop.f32.mrb[5].mxu0  ;;  %v2138_v37 = vadd.f32 %v2130_v1, %v2090_v35  ;;  %v975_v38 = vpop.f32.mrb[5].mxu1 }
 0x13d   : > { %v1723_v32 = vadd.f32 %v1722_v30, %v1716_v28  ;;  %v1702_v33 = vadd.f32 %v2136_v22, %v1701_v29  ;;  %v2131_v3 = vpop.f32.mrb[6].mxu0  ;;  %v2139_v16 = vadd.f32 %v1677_v34, %v975_v38  ;;  %v2091_v40 = vpop.f32.mrb[6].mxu1 }
 0x13e   : > { %v1680_v39 = vpop.f32.mrb[7].mxu0  ;;  %v2140_v41 = vadd.f32 %v2131_v3, %v2091_v40  ;;  %v978_v42 = vpop.f32.mrb[7].mxu1  ;;  %v1720_v48 = vmul.f32 %v2138_v37, %v2138_v37 }
 0x13f   : > { %v1724_v36 = vadd.f32 %v1723_v32, %v1717_v31  ;;  %v1703_v43 = vadd.f32 %v2139_v16, %v1702_v33  ;;  %v1718_v45 = vmul.f32 %v2139_v16, %v2139_v16  ;;  %v2141_v23 = vadd.f32 %v1680_v39, %v978_v42 }
 0x140   : > { %v1721_v50 = vmul.f32 %v2140_v41, %v2140_v41 }
 0x141   : > { %v1725_v46 = vadd.f32 %v1724_v36, %v1718_v45  ;;  %v1704_v15 = vadd.f32 %v2141_v23, %v1703_v43  ;;  %v1719_v47 = vmul.f32 %v2141_v23, %v2141_v23 }
 0x143   : > { %v1705_v49 = vadd.f32 %v2138_v37, %v1704_v15  ;;  %v1726_v10 = vadd.f32 %v1725_v46, %v1719_v47 }
 0x145   : > { %v1706_v51 = vadd.f32 %v2140_v41, %v1705_v49  ;;  %v1727_v52 = vadd.f32 %v1726_v10, %v1720_v48 }
 0x147   : > { %v1707_v53 = vrot.slane %v1706_v51, 4  ;;  %v1728_v54 = vadd.f32 %v1727_v52, %v1721_v50 }
 0x149   : > { %v1708_v55 = vadd.f32 %v1707_v53, %v1706_v51  ;;  %v1729_v56 = vrot.slane %v1728_v54, 4 }
 0x14b   : > { %v1709_v57 = vrot.slane %v1708_v55, 2  ;;  %v1730_v58 = vadd.f32 %v1729_v56, %v1728_v54 }
 0x14d   : > { %v1710_v59 = vadd.f32 %v1709_v57, %v1708_v55  ;;  %v1731_v60 = vrot.slane %v1730_v58, 2 }
 0x14f   : > { %v1711_v61 = vrot.slane %v1710_v59, 1  ;;  %v1732_v62 = vadd.f32 %v1731_v60, %v1730_v58 }
 0x151   : > { %v1712_v63 = vadd.f32 %v1711_v61, %v1710_v59  ;;  %v1733_v0 = vrot.slane %v1732_v62, 1 }
 0x153   : > { %1713 = vst [vmem:[%s276_s12] sm:$0x1] %v1712_v63  ;;  %v1734_v2 = vadd.f32 %v1733_v0, %v1732_v62 }
 0x155   : > { %1735 = vst [vmem:[%s276_s12 + $0x1] sm:$0x1] %v1734_v2 }
 0x156   : > { %2301 = shalt.err (!%p2298_p5)
}
 0x157   : > { %s2302_s8 = scalar_lea.hbm %s2722_s17, 32  ;;  %s2306_s25 = scalar_lea.hbm %s2774_s5, 64 }
 0x158   : > { %p2303_p6 = scmp.ne.s32.totalorder %s2722_s17, %s2302_s8  ;;  %p2307_p10 = scmp.lt.u32.totalorder %s2722_s17, %s2774_s5 }
 0x159   : > { %p2308_p11 = scmp.lt.u32.totalorder %s2306_s25, %s2302_s8  ;;  %p2310_p13 = scmp.lt.u32.totalorder %s2302_s8, %s2722_s17 }
 0x15a   : > { %p2304_p7 = pnand %p2303_p6, %p2439_p4 }
 0x15b   : > { %p2309_p12 = por %p2308_p11, %p2307_p10 }
 0x15c   : > { %p2305_p9 = pneg %p2304_p7 }
 0x15d   : > { %p2311_p0 = por %p2310_p13, %p2309_p12 }
 0x15f   : > { %p2312_p1 = pnand %p2311_p0, %p2305_p9 }
 0x161   : > { %2315 = shalt.err (!%p2312_p1)
}
 0x162   : > { %2209 = dma.vmem_to_hbm [thread:$0]  (%p2439_p4), %s2724_s13, 32, %s2722_s17, %s1737_s24  }
 0x163 PF: > { %p2215_p2 = scmp.ge.s32.totalorder %s2366_s23, 2  ;;  %s1763_s12 = sand.u32 1, %s2346_s18  }
 0x164   : > { %s1764_s14 = scalar_lea.sflag [#allocation3], %s1763_s12 }
 0x165   : > { %p2212_p3 = pnand %p2215_p2, %p2446_p8 }
 0x167   : > { %2341 = dma.done.wait (!%p2212_p3), %s1764_s14, 32  }
 0x168   : > { %2343 = vsyncadd (!%p2212_p3), %s1764_s14, 4294967264  ;;  %s18_s23 = sadd.s32 1, %s2366_s23   ;;  %s2779_s18 = smov %s2350_s19 }
 0x169   : > { %p15_p5 = scmp.ge.s32.totalorder %s18_s23, 4   ;;  %s2780_s19 = smov %s2354_s20 }
 0x16a   : > { %s2781_s20 = smov %s2452_s6  ;;  %s2782_s21 = smov %s2362_s22 }
 0x16b   : > { %s2783_s22 = smov %s2785_s26  ;;  %17 = sbr.rel (!%p15_p5) target bundleno = 4 (0x4), region = 98 }
 0x172   :  { %1769 = vsyncpa [#allocation3], 1 }
 0x173   :  { %1771 = vsyncpa [#allocation3 + $0x1], 1 }

// kernel: tpu_custom_call.1
= control target key start
LH: loop header
LB: loop body
LE: loop exit
PB: predicated region body
PF: predicated region fallthrough
CT: control target
= control target key end

     0   :  { %10 = vsyncpa [#allocation3], 0  ;;  %s2769_s0 = inlined_call_operand.vmem [shape: bf16[2,9,9,4], index: 0, kind: input, shape index: {}]   ;;  %s2770_s1 = inlined_call_operand.vmem [shape: bf16[2,9,9,4], index: 1, kind: input, shape index: {}]   ;;  %s2771_s2 = inlined_call_operand.vmem [shape: bf16[2,9,9,4], index: 2, kind: input, shape index: {}]   ;;  %s2772_s3 = inlined_call_operand.vmem [shape: bf16[2,9,9,4], index: 3, kind: input, shape index: {}]   ;;  %s2773_s4 = inlined_call_operand.vmem [shape: bf16[9,4,128], index: 4, kind: input, shape index: {}]   ;;  %s2774_s5 = inlined_call_operand.hbm [shape: f32[2,1,2,128], index: 5, kind: output, shape index: {}]  }
   0x1   :  { %12 = vsyncpa [#allocation3 + $0x1], 0  ;;  %s2399_s18 = smov 0   ;;  %s2401_s19 = smov 0  }
   0x2   :  { %s2403_s20 = smov 0   ;;  %s2405_s21 = smov 0  }
   0x3   :  { %s2407_s22 = smov 0   ;;  %s2409_s23 = smov 0  }
   0x4 LB: > { %s1871_s24 = sadd.s32 4294967295, %s2366_s23   ;;  %s1872_s25 = sadd.s32 4294967294, %s2366_s23   ;;  %s2366_s23 = sphi %s2409_s23, %s18_s23   ;;  %s2362_s22 = sphi %s2407_s22, %s2783_s22   ;;  %s2358_s21 = sphi %s2405_s21, %s2782_s21   ;;  %s2354_s20 = sphi %s2403_s20, %s2781_s20   ;;  %s2350_s19 = sphi %s2401_s19, %s2780_s19   ;;  %s2346_s18 = sphi %s2399_s18, %s2779_s18  }
   0x5   : > { %s30_s26 = sadd.s32 1, %s2362_s22  ;;  %s164_s27 = sadd.s32 1, %s2354_s20 }
   0x6   : > { %p32_p0 = scmp.ge.s32.totalorder %s30_s26, 2  ;;  %p174_p1 = scmp.ne.s32.totalorder %s2354_s20, %s2350_s19 }
   0x7   : > { %p175_p2 = scmp.eq.s32.totalorder %s1871_s24, 1  ;;  %p180_p3 = scmp.ne.s32.totalorder %s2350_s19, %s2346_s18 }
   0x8   : > { %s2785_s26 = smov (%p32_p0, %s30_s26), 0  ;;  %p181_p5 = scmp.eq.s32.totalorder %s1872_s25, 1 }
   0x9   : > { %p2439_p4 = por %p175_p2, %p174_p1  ;;  %s159_s29 = ssub.s32 %s2362_s22, %s2785_s26 }
   0xa   : > { %p1875_p6 = scmp.ge.s32.totalorder %s2366_s23, 1  ;;  %p162_p7 = scmp.eq.s32.totalorder %s159_s29, 0 }
   0xb   : > { %p2446_p8 = por %p181_p5, %p180_p3  ;;  %p234_p9 = scmp.lt.s32.totalorder %s2366_s23, 3 }
   0xc   : > { %s2452_s6 = scalar_select %p162_p7, %s2354_s20, %s164_s27  }
   0xd   : > { %p235_p10 = pnand %p1875_p6, %p234_p9 }
   0xe   : > { %v1881_v0 = vld [vmem:[%s2773_s4 + $0x2] sm:$0x3] (!%p235_p10)  ;;  %vm356_vm0 = vcmask (!%p235_p10), 1041408   ;;  %v2460_v1 = vld [vmem:[%s2773_s4 + $0x8] sm:$0x3] (!%p235_p10)  ;;  %p277_p11 = scmp.lt.s32.totalorder (!%p235_p10), %s2358_s21, 1 }
   0xf   : > { %238 = sbr.rel (%p235_p10) target bundleno = 355 (0x163), region = 40  ;;  %2198 = vmatprep.subr.msk.bf16.mxu1 (!%p235_p10), %vm356_vm0, %v1881_v0  ;;  %2202 = vmatprep.subr.msk.bf16.mxu0 (!%p235_p10), %vm356_vm0, %v2460_v1  ;;  %v358_v2 = vsel (!%p235_p10), %vm356_vm0, %v1881_v0, 0  ;;  %v2469_v3 = vsel (!%p235_p10), %vm356_vm0, %v2460_v1, 0  ;;  %v310_v4 = vld [vmem:[%s2773_s4] sm:$0x3] (!%p235_p10)  ;;  %vm343_vm1 = vcmask (!%p235_p10), 31744  }
  0x10   : > { %2043 = vmatpush3.bf16.msra.mxu1 (!%p235_p10), %v358_v2  ;;  %2083 = vmatpush3.bf16.msra.mxu0 (!%p235_p10), %v2469_v3  ;;  %v1925_v5 = vld [vmem:[%s2773_s4 + $0xa] sm:$0x3] (!%p235_p10)  ;;  %v458_v6 = vsel (!%p235_p10), %vm356_vm0, %v310_v4, 0  ;;  %v1942_v9 = vld [vmem:[%s2773_s4 + $0xc] sm:$0x3] (!%p235_p10)  ;;  %s1994_s11 = sshll.u32 (!%p235_p10), %s2358_s21, 5 }
  0x11   : > { %2199 = vmatprep.subr.msk.bf16.mxu1 (!%p235_p10), %vm356_vm0, %v310_v4  ;;  %2204 = vmatprep.subr.msk.bf16.mxu0 (!%p235_p10), %vm356_vm0, %v1925_v5  ;;  %v1153_v7 = vsel (!%p235_p10), %vm356_vm0, %v1925_v5, 0  ;;  %v1898_v10 = vld [vmem:[%s2773_s4 + $0x4] sm:$0x3] (!%p235_p10)  ;;  %vm541_vm2 = vsmask.f32 (!%p235_p10), 3328  ;;  %v2519_v15 = vsel (!%p235_p10), %vm356_vm0, %v1942_v9, 0  ;;  %s2722_s17 = scalar_lea.hbm (!%p235_p10), %s2774_s5, %s1994_s11 }
  0x12   : > { %vm542_vm3 = vsmask.f32 (!%p235_p10), 7440  ;;  %v2522_v16 = vsel (!%p235_p10), %vm356_vm0, %v1898_v10, 0 }
  0x13   : > { %vm2545_vm4 = vmor (!%p235_p10), %vm541_vm2, %vm542_vm3 }
  0x16   : > { %s278_s13 = scalar_select %p277_p11, %s2358_s21, 1 }
  0x17   : > { %s2368_s21 = smov [#allocation2]  }
  0x18   : > { %s2481_s16 = smul.u32 72, %s278_s13  ;;  %s2292_s27 = sshll.u32 %s2368_s21, 4  ;;  %s2293_s27 = int_to_ptr.vmem [resolvable:$false] %s2292_s27 }
  0x19   : > { %s2294_s29 = scalar_lea.vmem %s2293_s27, 64 }
  0x1a   : > { %s2487_s25 = scalar_lea.vmem %s2770_s1, %s2481_s16  ;;  %s2496_s7 = scalar_lea.vmem %s2772_s3, %s2481_s16 }
  0x1b   : > { %v2264_v8 = vld [vmem:[%s2487_s25] ss:$8 sps:$4 sm:$0xff]   ;;  %v2266_v12 = vld [vmem:[%s2487_s25 + $0x10] ss:$8 sps:$4 sm:$0xff]   ;;  %s2511_s14 = scalar_lea.vmem %s2771_s2, %s2481_s16  ;;  %s2539_s24 = scalar_lea.vmem %s2769_s0, %s2481_s16 }
  0x1c   : > { %v2265_v11 = vld [vmem:[%s2496_s7] ss:$8 sps:$4 sm:$0xff]   ;;  %2044 = vmatprep.mubr.msk.bf16.mxu1 %vm343_vm1, %v2264_v8  ;;  %v2267_v13 = vld [vmem:[%s2496_s7 + $0x10] ss:$8 sps:$4 sm:$0xff]   ;;  %v999_v19 = vld [vmem:[%s2511_s14 + $0x4] sm:$0x1] }
  0x1d   : > { %2084 = vmatprep.mubr.msk.bf16.mxu0 %vm343_vm1, %v2265_v11  ;;  %2045 = vmatmul.mubr.msk.bf16.vlgmr.msra.gmra.mrb[0].mxu1 %vm343_vm1, %v2266_v12  ;;  %v2268_v14 = vld [vmem:[%s2487_s25 + $0x20] ss:$8 sps:$4 sm:$0xff]   ;;  %v2269_v17 = vld [vmem:[%s2487_s25 + $0x30] ss:$8 sps:$4 sm:$0xff]   ;;  %v1001_v21 = vld [vmem:[%s2511_s14 + $0xc] sm:$0x1] }
  0x1e   : > { %2053 = vmatpush3.bf16.msra.mxu1 %v458_v6  ;;  %2085 = vmatmul.mubr.msk.bf16.vlgmr.msra.gmra.mrb[0].mxu0 %vm343_vm1, %v2267_v13  ;;  %v998_v18 = vld [vmem:[%s2511_s14] sm:$0xf]  ;;  %v1000_v20 = vld [vmem:[%s2511_s14 + $0x8] sm:$0xf]  ;;  %v1024_v24 = vshll.u32 %v999_v19, 16  ;;  %v1038_v27 = vshll.u32 %v1001_v21, 16 }
  0x1f   : > { %2093 = vmatpush3.bf16.msra.mxu0 %v1153_v7  ;;  %2048 = vmatprep.mubr.msk.bf16.mxu1 %vm343_vm1, %v2268_v14  ;;  %v1015_v22 = vshrl.u32 %v998_v18, 16  ;;  %v1018_v23 = vshll.u32 %v998_v18, 16  ;;  %v1029_v25 = vshrl.u32 %v1000_v20, 16  ;;  %v1032_v26 = vshll.u32 %v1000_v20, 16  ;;  %v1002_v28 = vld [vmem:[%s2511_s14 + $0x10] sm:$0xf] }
  0x20   : > { %2205 = vmatprep.subr.msk.bf16.mxu0 %vm356_vm0, %v1942_v9  ;;  %2200 = vmatprep.subr.msk.bf16.mxu1 %vm356_vm0, %v1898_v10  ;;  %v1003_v29 = vld [vmem:[%s2511_s14 + $0x14] sm:$0x1]  ;;  %v1026_v32 = vrot.slane %v1024_v24, 5  ;;  %v1004_v34 = vld [vmem:[%s2511_s14 + $0x18] sm:$0xf]  ;;  %v1040_v36 = vrot.slane %v1038_v27, 5 }
  0x21   : > { %v1017_v30 = vrot.slane %v1015_v22, 4  ;;  %v1020_v31 = vrot.slane %v1018_v23, 5  ;;  %v1031_v33 = vrot.slane %v1029_v25, 4  ;;  %v1034_v35 = vrot.slane %v1032_v26, 5  ;;  %v1005_v37 = vld [vmem:[%s2511_s14 + $0x1c] sm:$0x1] }
  0x22   : > { %v1043_v38 = vshrl.u32 %v1002_v28, 16  ;;  %v1046_v39 = vshll.u32 %v1002_v28, 16  ;;  %v1052_v41 = vshll.u32 %v1003_v29, 16  ;;  %v1057_v42 = vshrl.u32 %v1004_v34, 16  ;;  %v2270_v53 = vld [vmem:[%s2539_s24] ss:$8 sps:$4 sm:$0xff]  }
  0x23   : > { %v1021_v40 = vor.u32 %v1020_v31, %v1017_v30  ;;  %v1060_v43 = vshll.u32 %v1004_v34, 16  ;;  %v1035_v45 = vor.u32 %v1034_v35, %v1031_v33  ;;  %v1066_v48 = vshll.u32 %v1005_v37, 16  ;;  %v2271_v59 = vld [vmem:[%s2539_s24 + $0x10] ss:$8 sps:$4 sm:$0xff]   ;;  %v1006_v60 = vld [vmem:[%s2511_s14 + $0x20] sm:$0xf] }
  0x24   : > { %v1045_v46 = vrot.slane %v1043_v38, 4  ;;  %v1048_v47 = vrot.slane %v1046_v39, 5  ;;  %v1054_v50 = vrot.slane %v1052_v41, 5  ;;  %v1059_v51 = vrot.slane %v1057_v42, 4  ;;  %v1007_v61 = vld [vmem:[%s2511_s14 + $0x24] sm:$0x1] }
  0x25   : > { %2049 = vmatmul.mubr.msk.bf16.gmra.mrb[4].mxu1 %vm343_vm1, %v2269_v17  ;;  %v1022_v49 = vrot.slane %v1021_v40, 4  ;;  %v1062_v52 = vrot.slane %v1060_v43, 5  ;;  %v1036_v54 = vrot.slane %v1035_v45, 4  ;;  %v1068_v56 = vrot.slane %v1066_v48, 5  ;;  %v1008_v0 = vld [vmem:[%s2511_s14 + $0x28] sm:$0xf] }
  0x26   : > { %v1049_v55 = vor.u32 %v1048_v47, %v1045_v46  ;;  %2054 = vmatprep.mubr.msk.bf16.mxu1 %vm343_vm1, %v2270_v53  ;;  %v1009_v2 = vld [vmem:[%s2511_s14 + $0x2c] sm:$0x1]  ;;  %v1071_v4 = vshrl.u32 %v1006_v60, 16  ;;  %v1074_v7 = vshll.u32 %v1006_v60, 16  ;;  %v1080_v8 = vshll.u32 %v1007_v61, 16 }
  0x27   : > { %v1027_v57 = vsel %vm2545_vm4, %v1022_v49, %v1026_v32  ;;  %v1063_v58 = vor.u32 %v1062_v52, %v1059_v51  ;;  %v1041_v62 = vsel %vm2545_vm4, %v1036_v54, %v1040_v36  ;;  %v1010_v9 = vld [vmem:[%s2511_s14 + $0x30] sm:$0xf]  ;;  %v2564_v10 = vld [vmem:[%s2773_s4 + $0x6] sm:$0x3]  ;;  %v1085_v13 = vshrl.u32 %v1008_v0, 16 }
  0x28   : > { %v1050_v63 = vrot.slane %v1049_v55, 4  ;;  %v1926_v5 = vcombine.low %v1027_v57, %v1041_v62  ;;  %v1073_v12 = vrot.slane %v1071_v4, 4  ;;  %v1088_v14 = vshll.u32 %v1008_v0, 16  ;;  %v1011_v17 = vld [vmem:[%s2511_s14 + $0x34] sm:$0x1] }
  0x29   : > { %v1064_v6 = vrot.slane %v1063_v58, 4  ;;  %v1076_v19 = vrot.slane %v1074_v7, 5  ;;  %v1082_v20 = vrot.slane %v1080_v8, 5  ;;  %v1094_v21 = vshll.u32 %v1009_v2, 16  ;;  %v1012_v22 = vld [vmem:[%s2511_s14 + $0x38] sm:$0xf] }
  0x2a   : > { %v1055_v11 = vsel %vm2545_vm4, %v1050_v63, %v1054_v50  ;;  %2094 = vmatprep.mubr.msk.bf16.mxu0 %vm343_vm1, %v1926_v5  ;;  %v2576_v23 = vld [vmem:[%s2773_s4 + $0xe] sm:$0x3]  ;;  %v1087_v25 = vrot.slane %v1085_v13, 4  ;;  %v1090_v26 = vrot.slane %v1088_v14, 5  ;;  %v1013_v27 = vld [vmem:[%s2511_s14 + $0x3c] sm:$0x1] }
  0x2b   : > { %v1069_v18 = vsel %vm2545_vm4, %v1064_v6, %v1068_v56  ;;  %v1099_v28 = vshrl.u32 %v1010_v9, 16  ;;  %v1077_v29 = vor.u32 %v1076_v19, %v1073_v12  ;;  %v1096_v30 = vrot.slane %v1094_v21, 5  ;;  %v2274_v53 = vld [vmem:[%s2539_s24 + $0x8] ss:$8 sps:$4 sm:$0xff]   ;;  %v525_v54 = vld [vmem:[%s2539_s24] sm:$0xf] }
  0x2c   : > { %v1927_v24 = vcombine.low %v1055_v11, %v1069_v18  ;;  %v1102_v31 = vshll.u32 %v1010_v9, 16  ;;  %v1108_v32 = vshll.u32 %v1011_v17, 16  ;;  %v1091_v33 = vor.u32 %v1090_v26, %v1087_v25  ;;  %v526_v56 = vld [vmem:[%s2539_s24 + $0x4] sm:$0x1]  ;;  %v527_v57 = vld [vmem:[%s2539_s24 + $0x8] sm:$0xf] }
  0x2d   : > { %2055 = vmatmul.mubr.msk.bf16.vlgmr.msra.gmra.mrb[0].mxu1 %vm343_vm1, %v2271_v59  ;;  %v1101_v34 = vrot.slane %v1099_v28, 4  ;;  %v1113_v35 = vshrl.u32 %v1012_v22, 16  ;;  %v1116_v36 = vshll.u32 %v1012_v22, 16  ;;  %v1078_v37 = vrot.slane %v1077_v29, 4  ;;  %v528_v58 = vld [vmem:[%s2539_s24 + $0xc] sm:$0x1] }
  0x2e   : > { %2063 = vmatpush3.bf16.msra.mxu1 %v2522_v16  ;;  %2095 = vmatmul.mubr.msk.bf16.vlgmr.msra.gmra.mrb[0].mxu0 %vm343_vm1, %v1927_v24  ;;  %v1104_v38 = vrot.slane %v1102_v31, 5  ;;  %v1122_v39 = vshll.u32 %v1013_v27, 16  ;;  %v2272_v16 = vld [vmem:[%s2539_s24 + $0x20] ss:$8 sps:$4 sm:$0xff]   ;;  %v1092_v40 = vrot.slane %v1091_v33, 4  ;;  %v1110_v46 = vrot.slane %v1108_v32, 5 }
  0x2f   : > { %2201 = vmatprep.subr.msk.bf16.mxu1 %vm356_vm0, %v2564_v10  ;;  %2103 = vmatpush3.bf16.msra.mxu0 %v2519_v15  ;;  %v1115_v41 = vrot.slane %v1113_v35, 4  ;;  %v1118_v42 = vrot.slane %v1116_v36, 5  ;;  %v1083_v43 = vsel %vm2545_vm4, %v1078_v37, %v1082_v20  ;;  %v2273_v15 = vld [vmem:[%s2539_s24 + $0x30] ss:$8 sps:$4 sm:$0xff]   ;;  %v545_v60 = vshrl.u32 %v525_v54, 16 }
  0x30   : > { %2206 = vmatprep.subr.msk.bf16.mxu0 %vm356_vm0, %v2576_v23  ;;  %v1105_v45 = vor.u32 %v1104_v38, %v1101_v34  ;;  %2058 = vmatprep.mubr.msk.bf16.mxu1 %vm343_vm1, %v2272_v16  ;;  %v1097_v47 = vsel %vm2545_vm4, %v1092_v40, %v1096_v30  ;;  %v1124_v49 = vrot.slane %v1122_v39, 5  ;;  %v548_v61 = vshll.u32 %v525_v54, 16  ;;  %v529_v63 = vld [vmem:[%s2539_s24 + $0x10] sm:$0xf]  ;;  %v530_v6 = vld [vmem:[%s2539_s24 + $0x14] sm:$0x1] }
  0x31   : > { %v1119_v48 = vor.u32 %v1118_v42, %v1115_v41  ;;  %v1928_v50 = vcombine.low %v1083_v43, %v1097_v47  ;;  %v554_v62 = vshll.u32 %v526_v56, 16  ;;  %v559_v2 = vshrl.u32 %v527_v57, 16  ;;  %v531_v11 = vld [vmem:[%s2539_s24 + $0x18] sm:$0xf]  ;;  %v532_v18 = vld [vmem:[%s2539_s24 + $0x1c] sm:$0x1] }
  0x32   : > { %v1106_v51 = vrot.slane %v1105_v45, 4  ;;  %v562_v4 = vshll.u32 %v527_v57, 16  ;;  %v568_v5 = vshll.u32 %v528_v58, 16  ;;  %v547_v7 = vrot.slane %v545_v60, 4  ;;  %v2275_v29 = vld [vmem:[%s2539_s24 + $0x18] ss:$8 sps:$4 sm:$0xff]  }
  0x33   : > { %v1120_v52 = vrot.slane %v1119_v48, 4  ;;  %2098 = vmatprep.mubr.msk.bf16.mxu0 %vm343_vm1, %v1928_v50  ;;  %v550_v8 = vrot.slane %v548_v61, 5  ;;  %v556_v9 = vrot.slane %v554_v62, 5  ;;  %v573_v12 = vshrl.u32 %v529_v63, 16  ;;  %v2276_v37 = vld [vmem:[%s2539_s24 + $0x28] ss:$8 sps:$4 sm:$0xff]  }
  0x34   : > { %v1111_v55 = vsel %vm2545_vm4, %v1106_v51, %v1110_v46  ;;  %v561_v13 = vrot.slane %v559_v2, 4  ;;  %v564_v14 = vrot.slane %v562_v4, 5  ;;  %v570_v17 = vrot.slane %v568_v5, 5  ;;  %v533_v40 = vld [vmem:[%s2539_s24 + $0x20] sm:$0xf] }
  0x35   : > { %2059 = vmatmul.mubr.msk.bf16.gmra.mrb[4].mxu1 %vm343_vm1, %v2273_v15  ;;  %v1125_v59 = vsel %vm2545_vm4, %v1120_v52, %v1124_v49  ;;  %v576_v19 = vshll.u32 %v529_v63, 16  ;;  %v551_v20 = vor.u32 %v550_v8, %v547_v7  ;;  %v575_v21 = vrot.slane %v573_v12, 4  ;;  %v534_v45 = vld [vmem:[%s2539_s24 + $0x24] sm:$0x1]  ;;  %v535_v46 = vld [vmem:[%s2539_s24 + $0x28] sm:$0xf] }
  0x36   : > { %v1929_v0 = vcombine.low %v1111_v55, %v1125_v59  ;;  %v582_v22 = vshll.u32 %v530_v6, 16  ;;  %v587_v24 = vshrl.u32 %v531_v11, 16  ;;  %v565_v25 = vor.u32 %v564_v14, %v561_v13  ;;  %v536_v48 = vld [vmem:[%s2539_s24 + $0x2c] sm:$0x1]  ;;  %v537_v55 = vld [vmem:[%s2539_s24 + $0x30] sm:$0xf] }
  0x37   : > { %v578_v26 = vrot.slane %v576_v19, 5  ;;  %v590_v27 = vshll.u32 %v531_v11, 16  ;;  %v596_v28 = vshll.u32 %v532_v18, 16  ;;  %v1395_v30 = vsel %vm356_vm0, %v2576_v23, 0  ;;  %v2623_v23 = vld [vmem:[%s2773_s4 + $0x10] sm:$0x3] }
  0x38   : > { %2099 = vmatmul.mubr.msk.bf16.gmra.mrb[4].mxu0 %vm343_vm1, %v1929_v0  ;;  %v552_v31 = vrot.slane %v551_v20, 4  ;;  %v584_v32 = vrot.slane %v582_v22, 5  ;;  %v589_v33 = vrot.slane %v587_v24, 4  ;;  %v566_v34 = vrot.slane %v565_v25, 4  ;;  %v538_v60 = vld [vmem:[%s2539_s24 + $0x34] sm:$0x1] }
  0x39   : > { %2104 = vmatprep.mubr.msk.bf16.mxu0 %vm343_vm1, %v2274_v53  ;;  %v579_v35 = vor.u32 %v578_v26, %v575_v21  ;;  %v592_v36 = vrot.slane %v590_v27, 5  ;;  %v598_v39 = vrot.slane %v596_v28, 5  ;;  %v803_v16 = vsel %vm356_vm0, %v2564_v10, 0  ;;  %v2277_v62 = vld [vmem:[%s2539_s24 + $0x38] ss:$8 sps:$4 sm:$0xff]  }
  0x3a   : > { %v557_v38 = vsel %vm2545_vm4, %v552_v31, %v556_v9  ;;  %v571_v41 = vsel %vm2545_vm4, %v566_v34, %v570_v17  ;;  %v601_v15 = vshrl.u32 %v533_v40, 16  ;;  %v604_v49 = vshll.u32 %v533_v40, 16  ;;  %v539_v0 = vld [vmem:[%s2539_s24 + $0x38] sm:$0xf]  ;;  %v540_v2 = vld [vmem:[%s2539_s24 + $0x3c] sm:$0x1] }
  0x3b   : > { %v580_v42 = vrot.slane %v579_v35, 4  ;;  %v593_v43 = vor.u32 %v592_v36, %v589_v33  ;;  %v1899_v47 = vcombine.low %v557_v38, %v571_v41  ;;  %v610_v10 = vshll.u32 %v534_v45, 16  ;;  %v2278_v14 = vld [vmem:[%s2487_s25 + $0x8] ss:$8 sps:$4 sm:$0xff]   ;;  %v2279_v35 = vld [vmem:[%s2487_s25 + $0x18] ss:$8 sps:$4 sm:$0xff]  }
  0x3c   : > { %v615_v50 = vshrl.u32 %v535_v46, 16  ;;  %v603_v53 = vrot.slane %v601_v15, 4  ;;  %v618_v54 = vshll.u32 %v535_v46, 16  ;;  %v606_v56 = vrot.slane %v604_v49, 5  ;;  %v1969_v40 = vld [vmem:[%s2539_s24 + $0xc] sm:$0x1] }
  0x3d   : > { %v585_v51 = vsel %vm2545_vm4, %v580_v42, %v584_v32  ;;  %v594_v52 = vrot.slane %v593_v43, 4  ;;  %2064 = vmatprep.mubr.msk.bf16.mxu1 %vm343_vm1, %v1899_v47  ;;  %v612_v57 = vrot.slane %v610_v10, 5  ;;  %v624_v59 = vshll.u32 %v536_v48, 16  ;;  %v1970_v41 = vld [vmem:[%s2539_s24 + $0x10] sm:$0xf] }
  0x3e   : > { %v617_v58 = vrot.slane %v615_v50, 4  ;;  %v620_v63 = vrot.slane %v618_v54, 5  ;;  %v629_v4 = vshrl.u32 %v537_v55, 16  ;;  %v607_v6 = vor.u32 %v606_v56, %v603_v53  ;;  %v1971_v42 = vld [vmem:[%s2539_s24 + $0x14] sm:$0x1] }
  0x3f   : > { %v599_v61 = vsel %vm2545_vm4, %v594_v52, %v598_v39  ;;  %v626_v7 = vrot.slane %v624_v59, 5  ;;  %v632_v8 = vshll.u32 %v537_v55, 16  ;;  %v638_v12 = vshll.u32 %v538_v60, 16  ;;  %v2282_v39 = vld [vmem:[%s2487_s25 + $0x28] ss:$8 sps:$4 sm:$0xff]  }
  0x40   : > { %2105 = vmatmul.mubr.msk.bf16.vlgmr.msra.gmra.mrb[0].mxu0 %vm343_vm1, %v2275_v29  ;;  %v1900_v5 = vcombine.low %v585_v51, %v599_v61  ;;  %v621_v9 = vor.u32 %v620_v63, %v617_v58  ;;  %v631_v11 = vrot.slane %v629_v4, 4  ;;  %v643_v13 = vshrl.u32 %v539_v0, 16  ;;  %v1972_v48 = vld [vmem:[%s2539_s24 + $0x18] sm:$0xf]  ;;  %v1973_v50 = vld [vmem:[%s2539_s24 + $0x1c] sm:$0x1] }
  0x41   : > { %2113 = vmatpush3.bf16.msra.mxu0 %v1395_v30  ;;  %2108 = vmatprep.mubr.msk.bf16.mxu0 %vm343_vm1, %v2276_v37  ;;  %v608_v17 = vrot.slane %v607_v6, 4  ;;  %v634_v18 = vrot.slane %v632_v8, 5  ;;  %v646_v19 = vshll.u32 %v539_v0, 16  ;;  %v652_v20 = vshll.u32 %v540_v2, 16  ;;  %v2280_v37 = vld [vmem:[%s2511_s14] ss:$8 sps:$4 sm:$0xff]  }
  0x42   : > { %2207 = vmatprep.subr.msk.bf16.mxu0 %vm356_vm0, %v2623_v23  ;;  %2065 = vmatmul.mubr.msk.bf16.vlgmr.msra.gmra.mrb[0].mxu1 %vm343_vm1, %v1900_v5  ;;  %v622_v21 = vrot.slane %v621_v9, 4  ;;  %v645_v22 = vrot.slane %v643_v13, 4  ;;  %v640_v26 = vrot.slane %v638_v12, 5  ;;  %v1625_v34 = vsel %vm356_vm0, %v2623_v23, 0  ;;  %v1974_v51 = vld [vmem:[%s2539_s24 + $0x20] sm:$0xf] }
  0x43   : > { %2073 = vmatpush3.bf16.msra.mxu1 %v803_v16  ;;  %v613_v24 = vsel %vm2545_vm4, %v608_v17, %v612_v57  ;;  %v635_v25 = vor.u32 %v634_v18, %v631_v11  ;;  %v648_v27 = vrot.slane %v646_v19, 5  ;;  %v654_v32 = vrot.slane %v652_v20, 5  ;;  %v1968_v16 = vld [vmem:[%s2539_s24 + $0x8] sm:$0xf]  ;;  %v2281_v52 = vld [vmem:[%s2511_s14 + $0x10] ss:$8 sps:$4 sm:$0xff]  }
  0x44   : > { %2203 = vmatprep.subr.msk.bf16.mxu1 %vm356_vm0, %v2460_v1  ;;  %v627_v28 = vsel %vm2545_vm4, %v622_v21, %v626_v7  ;;  %v1487_v43 = vshrl.u32 %v1968_v16, 16  ;;  %v1490_v45 = vshll.u32 %v1968_v16, 16  ;;  %v1496_v23 = vshll.u32 %v1969_v40, 16  ;;  %v2283_v53 = vld [vmem:[%s2487_s25 + $0x38] ss:$8 sps:$4 sm:$0xff]   ;;  %s274_s25 = sand.u32 1, %s2350_s19  }
  0x45   : > { %v1901_v29 = vcombine.low %v613_v24, %v627_v28  ;;  %v636_v30 = vrot.slane %v635_v25, 4  ;;  %v649_v31 = vor.u32 %v648_v27, %v645_v22  ;;  %v1501_v46 = vshrl.u32 %v1970_v41, 16  ;;  %v1975_v58 = vld [vmem:[%s2539_s24 + $0x24] sm:$0x1]  ;;  %v2284_v5 = vld [vmem:[%s2511_s14 + $0x20] ss:$8 sps:$4 sm:$0xff]  }
  0x46   : > { %v1504_v15 = vshll.u32 %v1970_v41, 16  ;;  %v1510_v47 = vshll.u32 %v1971_v42, 16  ;;  %v1489_v49 = vrot.slane %v1487_v43, 4  ;;  %v1492_v10 = vrot.slane %v1490_v45, 5  ;;  %v1976_v17 = vld [vmem:[%s2539_s24 + $0x28] sm:$0xf] }
  0x47   : > { %2068 = vmatprep.mubr.msk.bf16.mxu1 %vm343_vm1, %v1901_v29  ;;  %v641_v1 = vsel %vm2545_vm4, %v636_v30, %v640_v26  ;;  %v650_v33 = vrot.slane %v649_v31, 4  ;;  %v1498_v54 = vrot.slane %v1496_v23, 5  ;;  %v1503_v55 = vrot.slane %v1501_v46, 4  ;;  %v1977_v20 = vld [vmem:[%s2539_s24 + $0x2c] sm:$0x1] }
  0x48   : > { %2109 = vmatmul.mubr.msk.bf16.gmra.mrb[4].mxu0 %vm343_vm1, %v2277_v62  ;;  %v1506_v56 = vrot.slane %v1504_v15, 5  ;;  %v1512_v57 = vrot.slane %v1510_v47, 5  ;;  %v1493_v59 = vor.u32 %v1492_v10, %v1489_v49  ;;  %v1515_v60 = vshrl.u32 %v1972_v48, 16  ;;  %v1978_v21 = vld [vmem:[%s2539_s24 + $0x30] sm:$0xf] }
  0x49   : > { %2114 = vmatprep.mubr.msk.bf16.mxu0 %vm343_vm1, %v2278_v14  ;;  %v655_v36 = vsel %vm2545_vm4, %v650_v33, %v654_v32  ;;  %v1518_v61 = vshll.u32 %v1972_v48, 16  ;;  %v1524_v62 = vshll.u32 %v1973_v50, 16  ;;  %v1529_v0 = vshrl.u32 %v1974_v51, 16  ;;  %v1979_v22 = vld [vmem:[%s2539_s24 + $0x34] sm:$0x1] }
  0x4a   : > { %v1902_v38 = vcombine.low %v641_v1, %v655_v36  ;;  %v1507_v63 = vor.u32 %v1506_v56, %v1503_v55  ;;  %v1532_v2 = vshll.u32 %v1974_v51, 16  ;;  %v1538_v4 = vshll.u32 %v1975_v58, 16  ;;  %v2285_v32 = vld [vmem:[%s2511_s14 + $0x30] ss:$8 sps:$4 sm:$0xff]   ;;  %v1981_v16 = vld [vmem:[%s2539_s24 + $0x3c] sm:$0x1] }
  0x4b   : > { %v1494_v6 = vrot.slane %v1493_v59, 4  ;;  %v1517_v7 = vrot.slane %v1515_v60, 4  ;;  %v1520_v8 = vrot.slane %v1518_v61, 5  ;;  %v1526_v9 = vrot.slane %v1524_v62, 5  ;;  %v1980_v36 = vld [vmem:[%s2539_s24 + $0x38] sm:$0xf] }
  0x4c   : > { %2069 = vmatmul.mubr.msk.bf16.gmra.mrb[4].mxu1 %vm343_vm1, %v1902_v38  ;;  %v1508_v11 = vrot.slane %v1507_v63, 4  ;;  %v1531_v12 = vrot.slane %v1529_v0, 4  ;;  %v1534_v13 = vrot.slane %v1532_v2, 5  ;;  %v1540_v14 = vrot.slane %v1538_v4, 5  ;;  %v1982_v43 = vld [vmem:[%s2539_s24 + $0x40] sm:$0xf] }
  0x4d   : > { %2074 = vmatprep.mubr.msk.bf16.mxu1 %vm343_vm1, %v2280_v37  ;;  %v1499_v18 = vsel %vm2545_vm4, %v1494_v6, %v1498_v54  ;;  %v1521_v19 = vor.u32 %v1520_v8, %v1517_v7  ;;  %v1543_v26 = vshrl.u32 %v1976_v17, 16  ;;  %v1546_v27 = vshll.u32 %v1976_v17, 16  ;;  %v1983_v45 = vld [vmem:[%s2539_s24 + $0x44] sm:$0x1]  ;;  %v2286_v15 = vld [vmem:[%s2496_s7 + $0x20] ss:$8 sps:$4 sm:$0xff]  }
  0x4e   : > { %v1513_v24 = vsel %vm2545_vm4, %v1508_v11, %v1512_v57  ;;  %v1535_v25 = vor.u32 %v1534_v13, %v1531_v12  ;;  %v1552_v30 = vshll.u32 %v1977_v20, 16  ;;  %v1557_v31 = vshrl.u32 %v1978_v21, 16  ;;  %v2287_v8 = vld [vmem:[%s2496_s7 + $0x30] ss:$8 sps:$4 sm:$0xff]   ;;  %s1876_s7 = sshll.u32 %s274_s25, 1  ;;  %s1737_s24 = scalar_lea.sflag [#allocation3], %s274_s25 }
  0x4f   : > { %v1985_v28 = vcombine.low %v1499_v18, %v1513_v24  ;;  %v1522_v29 = vrot.slane %v1521_v19, 4  ;;  %v1545_v33 = vrot.slane %v1543_v26, 4  ;;  %v1571_v23 = vshrl.u32 %v1980_v36, 16  ;;  %s276_s12 = scalar_lea.vmem [#allocation2], %s1876_s7 }
  0x50   : > { %2115 = vmatmul.mubr.msk.bf16.vlgmr.msra.gmra.mrb[0].mxu0 %vm343_vm1, %v2279_v35  ;;  %v1536_v1 = vrot.slane %v1535_v25, 4  ;;  %v1560_v35 = vshll.u32 %v1978_v21, 16  ;;  %v1554_v37 = vrot.slane %v1552_v30, 5  ;;  %v1559_v38 = vrot.slane %v1557_v31, 4  ;;  %s1751_s13 = sshll.u32 %s276_s12, 4  ;;  %s2724_s13 = int_to_ptr.vmem [resolvable:$true] %s1751_s13 }
  0x51   : > { %2123 = vmatpush3.bf16.msra.mxu0 %v1625_v34  ;;  %2118 = vmatprep.mubr.msk.bf16.mxu0 %vm343_vm1, %v2282_v39  ;;  %v1548_v34 = vrot.slane %v1546_v27, 5  ;;  %v1566_v39 = vshll.u32 %v1979_v22, 16  ;;  %v1574_v48 = vshll.u32 %v1980_v36, 16  ;;  %v1580_v49 = vshll.u32 %v1981_v16, 16  ;;  %s2288_s16 = scalar_lea.vmem %s2724_s13, 32  ;;  %p2295_p1 = scmp.lt.s32.totalorder %s2724_s13, %s2293_s27 }
  0x52   : > { %v1541_v40 = vsel %vm2545_vm4, %v1536_v1, %v1540_v14  ;;  %v1562_v42 = vrot.slane %v1560_v35, 5  ;;  %v1573_v51 = vrot.slane %v1571_v23, 4  ;;  %v1588_v54 = vshll.u32 %v1982_v43, 16  ;;  %p2289_p12 = scmp.ne.s32.totalorder %s2724_s13, %s2288_s16  ;;  %p2296_p2 = scmp.lt.s32.totalorder %s2294_s29, %s2288_s16 }
  0x53   : > { %v1549_v41 = vor.u32 %v1548_v34, %v1545_v33  ;;  %v1568_v47 = vrot.slane %v1566_v39, 5  ;;  %v1594_v55 = vshll.u32 %v1983_v45, 16  ;;  %v1582_v60 = vrot.slane %v1580_v49, 5 }
  0x54   : > { %2075 = vmatmul.mubr.msk.bf16.vlgmr.msra.gmra.mrb[0].mxu1 %vm343_vm1, %v2281_v52  ;;  %v1563_v50 = vor.u32 %v1562_v42, %v1559_v38  ;;  %v1585_v52 = vshrl.u32 %v1982_v43, 16  ;;  %v1590_v61 = vrot.slane %v1588_v54, 5  ;;  %p2290_p13 = pnand %p2289_p12, %p2439_p4  ;;  %p2297_p3 = por %p2296_p2, %p2295_p1 }
  0x55   : > { %2133 = vmatpush3.bf16.msra.mxu1 %v2469_v3  ;;  %2078 = vmatprep.mubr.msk.bf16.mxu1 %vm343_vm1, %v2284_v5  ;;  %v1527_v3 = vsel %vm2545_vm4, %v1522_v29, %v1526_v9  ;;  %v1550_v10 = vrot.slane %v1549_v41, 4  ;;  %v1596_v4 = vrot.slane %v1594_v55, 5 }
  0x56   : > { %v1986_v46 = vcombine.low %v1527_v3, %v1541_v40  ;;  %v1564_v57 = vrot.slane %v1563_v50, 4  ;;  %v1587_v58 = vrot.slane %v1585_v52, 4  ;;  %p2291_p0 = pneg %p2290_p13 }
  0x57   : > { %v1555_v56 = vsel %vm2545_vm4, %v1550_v10, %v1554_v37 }
  0x58   : > { %2119 = vmatmul.mubr.msk.bf16.gmra.mrb[4].mxu0 %vm343_vm1, %v2283_v53  ;;  %v1576_v53 = vrot.slane %v1574_v48, 5  ;;  %v1569_v62 = vsel %vm2545_vm4, %v1564_v57, %v1568_v47  ;;  %v1591_v2 = vor.u32 %v1590_v61, %v1587_v58  ;;  %p2298_p5 = pnand %p2297_p3, %p2291_p0 }
  0x59   : > { %2124 = vmatprep.mubr.msk.bf16.mxu0 %vm343_vm1, %v1985_v28  ;;  %v1987_v63 = vcombine.low %v1555_v56, %v1569_v62 }
  0x5a   : > { %v1577_v59 = vor.u32 %v1576_v53, %v1573_v51  ;;  %v1592_v6 = vrot.slane %v1591_v2, 4 }
  0x5c   : > { %2079 = vmatmul.mubr.msk.bf16.gmra.mrb[4].mxu1 %vm343_vm1, %v2285_v32  ;;  %v1578_v0 = vrot.slane %v1577_v59, 4  ;;  %v1597_v7 = vsel %vm2545_vm4, %v1592_v6, %v1596_v4 }
  0x5d   : > { %2088 = vmatprep.mubr.msk.bf16.mxu1 %vm343_vm1, %v2286_v15 }
  0x5e   : > { %v1583_v5 = vsel %vm2545_vm4, %v1578_v0, %v1582_v60 }
  0x5f   : > { %v1988_v9 = vcombine.low %v1583_v5, %v1597_v7 }
  0x60   : > { %2125 = vmatmul.mubr.msk.bf16.vlgmr.msra.gmra.mrb[0].mxu0 %vm343_vm1, %v1986_v46 }
  0x61   : > { %2128 = vmatprep.mubr.msk.bf16.mxu0 %vm343_vm1, %v1987_v63 }
  0x68   : > { %2129 = vmatmul.mubr.msk.bf16.gmra.mrb[4].mxu0 %vm343_vm1, %v1988_v9  ;;  %2089 = vmatmul.mubr.msk.bf16.vlgmr.msra.gmra.mrb[4].mxu1 %vm343_vm1, %v2287_v8 }
 0x127   : > { %v2076_v11 = vpop.f32.mrb[0].mxu1 }
 0x128   : > { %v839_v12 = vpop.f32.mrb[1].mxu1 }
 0x129   : > { %v2077_v13 = vpop.f32.mrb[2].mxu1 }
 0x12a   : > { %v842_v14 = vpop.f32.mrb[3].mxu1 }
 0x133   : > { %v2126_v17 = vpop.f32.mrb[0].mxu0 }
 0x134   : > { %v2134_v18 = vadd.f32 %v2126_v17, %v2076_v11  ;;  %v1661_v19 = vpop.f32.mrb[1].mxu0 }
 0x135   : > { %v2135_v20 = vadd.f32 %v1661_v19, %v839_v12  ;;  %v2127_v21 = vpop.f32.mrb[2].mxu0 }
 0x136   : > { %v2136_v22 = vadd.f32 %v2127_v21, %v2077_v13  ;;  %v1664_v24 = vpop.f32.mrb[3].mxu0  ;;  %v1716_v28 = vmul.f32 %v2134_v18, %v2134_v18 }
 0x137   : > { %v2137_v25 = vadd.f32 %v1664_v24, %v842_v14  ;;  %v1714_v44 = vmul.f32 %v2135_v20, %v2135_v20 }
 0x138   : > { %v1717_v31 = vmul.f32 %v2136_v22, %v2136_v22 }
 0x139   : > { %v1700_v26 = vadd.f32 %v2137_v25, %v2135_v20  ;;  %v1715_v27 = vmul.f32 %v2137_v25, %v2137_v25 }
 0x13b   : > { %v1701_v29 = vadd.f32 %v2134_v18, %v1700_v26  ;;  %v1722_v30 = vadd.f32 %v1715_v27, %v1714_v44  ;;  %v2130_v1 = vpop.f32.mrb[4].mxu0  ;;  %v2090_v35 = vpop.f32.mrb[4].mxu1 }
 0x13c   : > { %v1677_v34 = vpop.f32.mrb[5].mxu0  ;;  %v2138_v37 = vadd.f32 %v2130_v1, %v2090_v35  ;;  %v975_v38 = vpop.f32.mrb[5].mxu1 }
 0x13d   : > { %v1723_v32 = vadd.f32 %v1722_v30, %v1716_v28  ;;  %v1702_v33 = vadd.f32 %v2136_v22, %v1701_v29  ;;  %v2131_v3 = vpop.f32.mrb[6].mxu0  ;;  %v2139_v16 = vadd.f32 %v1677_v34, %v975_v38  ;;  %v2091_v40 = vpop.f32.mrb[6].mxu1 }
 0x13e   : > { %v1680_v39 = vpop.f32.mrb[7].mxu0  ;;  %v2140_v41 = vadd.f32 %v2131_v3, %v2091_v40  ;;  %v978_v42 = vpop.f32.mrb[7].mxu1  ;;  %v1720_v48 = vmul.f32 %v2138_v37, %v2138_v37 }
 0x13f   : > { %v1724_v36 = vadd.f32 %v1723_v32, %v1717_v31  ;;  %v1703_v43 = vadd.f32 %v2139_v16, %v1702_v33  ;;  %v1718_v45 = vmul.f32 %v2139_v16, %v2139_v16  ;;  %v2141_v23 = vadd.f32 %v1680_v39, %v978_v42 }
 0x140   : > { %v1721_v50 = vmul.f32 %v2140_v41, %v2140_v41 }
 0x141   : > { %v1725_v46 = vadd.f32 %v1724_v36, %v1718_v45  ;;  %v1704_v15 = vadd.f32 %v2141_v23, %v1703_v43  ;;  %v1719_v47 = vmul.f32 %v2141_v23, %v2141_v23 }
 0x143   : > { %v1705_v49 = vadd.f32 %v2138_v37, %v1704_v15  ;;  %v1726_v10 = vadd.f32 %v1725_v46, %v1719_v47 }
 0x145   : > { %v1706_v51 = vadd.f32 %v2140_v41, %v1705_v49  ;;  %v1727_v52 = vadd.f32 %v1726_v10, %v1720_v48 }
 0x147   : > { %v1707_v53 = vrot.slane %v1706_v51, 4  ;;  %v1728_v54 = vadd.f32 %v1727_v52, %v1721_v50 }
 0x149   : > { %v1708_v55 = vadd.f32 %v1707_v53, %v1706_v51  ;;  %v1729_v56 = vrot.slane %v1728_v54, 4 }
 0x14b   : > { %v1709_v57 = vrot.slane %v1708_v55, 2  ;;  %v1730_v58 = vadd.f32 %v1729_v56, %v1728_v54 }
 0x14d   : > { %v1710_v59 = vadd.f32 %v1709_v57, %v1708_v55  ;;  %v1731_v60 = vrot.slane %v1730_v58, 2 }
 0x14f   : > { %v1711_v61 = vrot.slane %v1710_v59, 1  ;;  %v1732_v62 = vadd.f32 %v1731_v60, %v1730_v58 }
 0x151   : > { %v1712_v63 = vadd.f32 %v1711_v61, %v1710_v59  ;;  %v1733_v0 = vrot.slane %v1732_v62, 1 }
 0x153   : > { %1713 = vst [vmem:[%s276_s12] sm:$0x1] %v1712_v63  ;;  %v1734_v2 = vadd.f32 %v1733_v0, %v1732_v62 }
 0x155   : > { %1735 = vst [vmem:[%s276_s12 + $0x1] sm:$0x1] %v1734_v2 }
 0x156   : > { %2301 = shalt.err (!%p2298_p5)
}
 0x157   : > { %s2302_s8 = scalar_lea.hbm %s2722_s17, 32  ;;  %s2306_s25 = scalar_lea.hbm %s2774_s5, 64 }
 0x158   : > { %p2303_p6 = scmp.ne.s32.totalorder %s2722_s17, %s2302_s8  ;;  %p2307_p10 = scmp.lt.u32.totalorder %s2722_s17, %s2774_s5 }
 0x159   : > { %p2308_p11 = scmp.lt.u32.totalorder %s2306_s25, %s2302_s8  ;;  %p2310_p13 = scmp.lt.u32.totalorder %s2302_s8, %s2722_s17 }
 0x15a   : > { %p2304_p7 = pnand %p2303_p6, %p2439_p4 }
 0x15b   : > { %p2309_p12 = por %p2308_p11, %p2307_p10 }
 0x15c   : > { %p2305_p9 = pneg %p2304_p7 }
 0x15d   : > { %p2311_p0 = por %p2310_p13, %p2309_p12 }
 0x15f   : > { %p2312_p1 = pnand %p2311_p0, %p2305_p9 }
 0x161   : > { %2315 = shalt.err (!%p2312_p1)
}
 0x162   : > { %2209 = dma.vmem_to_hbm [thread:$0]  (%p2439_p4), %s2724_s13, 32, %s2722_s17, %s1737_s24  }
 0x163 PF: > { %p2215_p2 = scmp.ge.s32.totalorder %s2366_s23, 2  ;;  %s1763_s12 = sand.u32 1, %s2346_s18  }
 0x164   : > { %s1764_s14 = scalar_lea.sflag [#allocation3], %s1763_s12 }
 0x165   : > { %p2212_p3 = pnand %p2215_p2, %p2446_p8 }
 0x167   : > { %2341 = dma.done.wait (!%p2212_p3), %s1764_s14, 32  }
 0x168   : > { %2343 = vsyncadd (!%p2212_p3), %s1764_s14, 4294967264  ;;  %s18_s23 = sadd.s32 1, %s2366_s23   ;;  %s2779_s18 = smov %s2350_s19 }
 0x169   : > { %p15_p5 = scmp.ge.s32.totalorder %s18_s23, 4   ;;  %s2780_s19 = smov %s2354_s20 }
 0x16a   : > { %s2781_s20 = smov %s2452_s6  ;;  %s2782_s21 = smov %s2362_s22 }
 0x16b   : > { %s2783_s22 = smov %s2785_s26  ;;  %17 = sbr.rel (!%p15_p5) target bundleno = 4 (0x4), region = 98 }
 0x172   :  { %1769 = vsyncpa [#allocation3], 1 }
 0x173   :  { %1771 = vsyncpa [#allocation3 + $0x1], 1 }

</bundles_post_ra>
